<compile_context>
chip_gen: v7x
topology: tpu7x:2x2x1
jax: 0.10.0
libtpu: 0.0.40
codegen_flags: <defaults>
</compile_context>

<pallas_src>
import jax
import jax.numpy as jnp
from jax.experimental import pallas as pl
from jax.experimental.pallas import tpu as pltpu

IMG_CHANS = 1                           # mode='od'
IMG_HW = 69
IN_DIM = IMG_CHANS * IMG_HW * IMG_HW    # 4761
HIDDEN_DIM = 128                        # small self-test size (module default: 1024)


def _round_up(x, m):
    return ((x + m - 1) // m) * m


def _vmem_capacity_bytes():
    """Physical VMEM of the current TPU; conservative fallback if unknown."""
    try:
        return pltpu.get_tpu_info().vmem_capacity_bytes
    except Exception:
        return 64 << 20   # v7x-sized fallback -> conservative tiling everywhere


def _choose_batch_tile(B, tm_cap):
    """Pick (TM, B_pad): bounded padding waste, >= 2 grid steps for large B."""
    if B < 16:
        # One block covering the whole batch: block dim == array dim, so no
        # 8-row alignment and no batch padding are needed.
        return B, B
    # Candidates are multiples of 8, capped so that (a) there are at least two
    # grid steps (lets the "parallel" batch axis engage both v7x TensorCores)
    # and (b) the double-buffered x/out tiles stay inside the VMEM budget.
    cap = max(8, min(tm_cap, _round_up((B + 1) // 2, 8)))
    best_tm, best_pad = 8, _round_up(B, 8) - B
    for tm in range(16, cap + 1, 8):
        pad = _round_up(B, tm) - B
        if pad < best_pad or (pad == best_pad and tm > best_tm):
            best_tm, best_pad = tm, pad
    return best_tm, _round_up(B, best_tm)


def sae_kernel(x_ref, w1_ref, b1_ref, w2_ref, b2_ref, o_ref):
    """Fused encoder -> ReLU -> (L1 identity) -> decoder for one batch tile.

    x_ref : (TM, IN_DIM)      f32   (cast to bf16 in VMEM)
    w1_ref: (IN_DIM, HIDDEN)  bf16  (transposed nn.Linear weight)
    b1_ref: (1, HIDDEN)       f32
    w2_ref: (HIDDEN, IN_DIM)  bf16  (transposed nn.Linear weight)
    b2_ref: (1, IN_DIM)       f32
    o_ref : (TM, IN_DIM)      f32
    """
    # Encoder: Linear + ReLU.  bf16 x bf16 MXU matmul with f32 accumulation.
    x = x_ref[...].astype(jnp.bfloat16)
    h = jnp.dot(x, w1_ref[...], preferred_element_type=jnp.float32) + b1_ref[...]
    h = jnp.maximum(h, 0.0)
    # L1Penality.apply(h, 0.1): identity in the forward pass (gradient-only op).
    # Decoder: Linear.
    y = jnp.dot(h.astype(jnp.bfloat16), w2_ref[...],
                preferred_element_type=jnp.float32)
    o_ref[...] = y + b2_ref[...]


def sparse_autoencoder_forward(x_nchw, w1_t, b1, w2_t, b2):
    """x_nchw: (B, 1, 69, 69) f32 -> (B, 1, 69, 69) f32.

    w1_t: (IN_DIM, HIDDEN) bf16, b1: (1, HIDDEN) f32,
    w2_t: (HIDDEN, IN_DIM) bf16, b2: (1, IN_DIM)  f32.
    """
    B = x_nchw.shape[0]

    # Per-generation tile cap / scoped-VMEM budget.
    vmem = _vmem_capacity_bytes()
    if vmem >= (100 << 20):            # v5e / v6e: 128 MiB physical VMEM
        tm_cap, vmem_limit = 512, 96 << 20
    else:                              # v7x (64 MiB physical) or unknown
        tm_cap, vmem_limit = 256, 48 << 20

    TM, B_pad = _choose_batch_tile(B, tm_cap)

    # Flatten (free bitcast for contiguous NCHW).  No feature pad, no cast.
    x_flat = x_nchw.reshape(B, IN_DIM)
    if B_pad != B:
        # Bounded batch padding (TM was chosen to keep B_pad - B small).
        x_flat = jnp.pad(x_flat, ((0, B_pad - B), (0, 0)))

    grid = (B_pad // TM,)

    out = pl.pallas_call(
        sae_kernel,
        out_shape=jax.ShapeDtypeStruct((B_pad, IN_DIM), jnp.float32),
        grid=grid,
        in_specs=[
            # x: walks the batch (double-buffered by the pipeline).
            pl.BlockSpec((TM, IN_DIM), lambda i: (i, 0)),
            # Weights / biases: grid-invariant, VMEM-resident, single-buffered.
            pl.BlockSpec((IN_DIM, HIDDEN_DIM), lambda i: (0, 0),
                         pipeline_mode=pl.Buffered(1)),
            pl.BlockSpec((1, HIDDEN_DIM), lambda i: (0, 0),
                         pipeline_mode=pl.Buffered(1)),
            pl.BlockSpec((HIDDEN_DIM, IN_DIM), lambda i: (0, 0),
                         pipeline_mode=pl.Buffered(1)),
            pl.BlockSpec((1, IN_DIM), lambda i: (0, 0),
                         pipeline_mode=pl.Buffered(1)),
        ],
        out_specs=pl.BlockSpec((TM, IN_DIM), lambda i: (i, 0)),
        compiler_params=pltpu.CompilerParams(
            dimension_semantics=("parallel",),
            vmem_limit_bytes=vmem_limit,
        ),
    )(x_flat, w1_t, b1, w2_t, b2)

    if B_pad != B:
        out = out[:B]
    # UnFlatten (free bitcast).
    return out.reshape(B, IMG_CHANS, IMG_HW, IMG_HW)


def init_params(key):
    """Deterministic init matching nn.Linear shapes (stored transposed, f32)."""
    k1, k2, k3, k4 = jax.random.split(key, 4)
    # nn.Linear(IN_DIM, HIDDEN): weight (HIDDEN, IN_DIM) -> stored as (IN_DIM, HIDDEN)
    bound1 = 1.0 / jnp.sqrt(IN_DIM)
    w1_t = jax.random.uniform(k1, (IN_DIM, HIDDEN_DIM), jnp.float32, -bound1, bound1)
    b1 = jax.random.uniform(k2, (1, HIDDEN_DIM), jnp.float32, -bound1, bound1)
    # nn.Linear(HIDDEN, IN_DIM): weight (IN_DIM, HIDDEN) -> stored as (HIDDEN, IN_DIM)
    bound2 = 1.0 / jnp.sqrt(HIDDEN_DIM)
    w2_t = jax.random.uniform(k3, (HIDDEN_DIM, IN_DIM), jnp.float32, -bound2, bound2)
    b2 = jax.random.uniform(k4, (1, IN_DIM), jnp.float32, -bound2, bound2)
    return w1_t, b1, w2_t, b2


def prepare_params(w1_t, b1, w2_t, b2):
    """Cast weights to bf16 for streaming; biases stay f32.  No padding needed."""
    return (w1_t.astype(jnp.bfloat16), b1.astype(jnp.float32),
            w2_t.astype(jnp.bfloat16), b2.astype(jnp.float32))


if __name__ == "__main__":
    key = jax.random.PRNGKey(0)
    kx, kp = jax.random.split(key)

    B = 16   # small batch; multi-step grid (TM=8, grid=(2,)) exercises the pipeline
    x = jax.random.normal(kx, (B, IMG_CHANS, IMG_HW, IMG_HW), jnp.float32)
    w1_t, b1, w2_t, b2 = init_params(kp)
    w1_bf, b1_f, w2_bf, b2_f = prepare_params(w1_t, b1, w2_t, b2)

    fwd = jax.jit(sparse_autoencoder_forward)
    out = fwd(x, w1_bf, b1_f, w2_bf, b2_f)
    out = jax.block_until_ready(out)

    # Pure-JAX reference with identical bf16/f32 precision choices.
    x_flat = x.reshape(B, IN_DIM).astype(jnp.bfloat16)
    h_ref = jnp.maximum(
        jnp.dot(x_flat, w1_bf, preferred_element_type=jnp.float32) + b1_f, 0.0)
    y_ref = jnp.dot(h_ref.astype(jnp.bfloat16), w2_bf,
                    preferred_element_type=jnp.float32) + b2_f
    ref = y_ref.reshape(B, IMG_CHANS, IMG_HW, IMG_HW)

    assert out.shape == (B, IMG_CHANS, IMG_HW, IMG_HW)
    assert out.dtype == jnp.float32
    assert jnp.allclose(out, ref, atol=2e-3, rtol=2e-3)

    print("KERNEL_OK")
</pallas_src>

<mosaic_0001>
module attributes {stable_mosaic.version = 11 : i64} {
  func.func @sae_kernel(%arg0: i32, %arg1: memref<8x4761xf32, #tpu.memory_space<vmem>>, %arg2: memref<4761x128xbf16, #tpu.memory_space<vmem>>, %arg3: memref<1x128xf32, #tpu.memory_space<vmem>>, %arg4: memref<128x4761xbf16, #tpu.memory_space<vmem>>, %arg5: memref<1x4761xf32, #tpu.memory_space<vmem>>, %arg6: memref<8x4761xf32, #tpu.memory_space<vmem>>) attributes {dimension_semantics = [#tpu.dimension_semantics<parallel>], iteration_bounds = array<i64: 2>, scalar_prefetch = 0 : i64, scratch_operands = 0 : i64, tpu.core_type = #tpu.core_type<tc>, window_params = [{transform_indices = @transform_0, window_bounds = array<i64: 8, 4761>}, {pipeline_mode = #tpu.pipeline_mode<synchronous>, transform_indices = @transform_1, window_bounds = array<i64: 4761, 128>}, {pipeline_mode = #tpu.pipeline_mode<synchronous>, transform_indices = @transform_2, window_bounds = array<i64: 1, 128>}, {pipeline_mode = #tpu.pipeline_mode<synchronous>, transform_indices = @transform_3, window_bounds = array<i64: 128, 4761>}, {pipeline_mode = #tpu.pipeline_mode<synchronous>, transform_indices = @transform_4, window_bounds = array<i64: 1, 4761>}, {transform_indices = @transform_5, window_bounds = array<i64: 8, 4761>}]} {
    %c0 = arith.constant 0 : index
    %c0_0 = arith.constant 0 : index
    %0 = vector.load %arg1[%c0, %c0_0] : memref<8x4761xf32, #tpu.memory_space<vmem>>, vector<8x4761xf32>
    %1 = arith.truncf %0 : vector<8x4761xf32> to vector<8x4761xbf16>
    %c0_1 = arith.constant 0 : index
    %c0_2 = arith.constant 0 : index
    %2 = vector.load %arg2[%c0_1, %c0_2] : memref<4761x128xbf16, #tpu.memory_space<vmem>>, vector<4761x128xbf16>
    %cst = arith.constant dense<0.000000e+00> : vector<8x128xf32>
    %3 = tpu.matmul %1, %2, %cst {dimension_numbers = #tpu.dot_dimension_numbers<[1], [0], [0], [1], [0, 0, 1, 1], [], []>} : vector<8x4761xbf16>, vector<4761x128xbf16>, vector<8x128xf32> -> vector<8x128xf32>
    %c0_3 = arith.constant 0 : index
    %c0_4 = arith.constant 0 : index
    %4 = vector.load %arg3[%c0_3, %c0_4] : memref<1x128xf32, #tpu.memory_space<vmem>>, vector<1x128xf32>
    %5 = vector.broadcast %4 : vector<1x128xf32> to vector<8x128xf32>
    %6 = arith.addf %3, %5 : vector<8x128xf32>
    %cst_5 = arith.constant 0.000000e+00 : f32
    %7 = vector.broadcast %cst_5 : f32 to vector<8x128xf32>
    %8 = arith.maximumf %6, %7 : vector<8x128xf32>
    %9 = arith.truncf %8 : vector<8x128xf32> to vector<8x128xbf16>
    %c0_6 = arith.constant 0 : index
    %c0_7 = arith.constant 0 : index
    %10 = vector.load %arg4[%c0_6, %c0_7] : memref<128x4761xbf16, #tpu.memory_space<vmem>>, vector<128x4761xbf16>
    %cst_8 = arith.constant dense<0.000000e+00> : vector<8x4761xf32>
    %11 = tpu.matmul %9, %10, %cst_8 {dimension_numbers = #tpu.dot_dimension_numbers<[1], [0], [0], [1], [0, 0, 1, 1], [], []>} : vector<8x128xbf16>, vector<128x4761xbf16>, vector<8x4761xf32> -> vector<8x4761xf32>
    %c0_9 = arith.constant 0 : index
    %c0_10 = arith.constant 0 : index
    %12 = vector.load %arg5[%c0_9, %c0_10] : memref<1x4761xf32, #tpu.memory_space<vmem>>, vector<1x4761xf32>
    %13 = vector.broadcast %12 : vector<1x4761xf32> to vector<8x4761xf32>
    %14 = arith.addf %11, %13 : vector<8x4761xf32>
    %c0_11 = arith.constant 0 : index
    %c0_12 = arith.constant 0 : index
    %15 = vector.load %arg6[%c0_11, %c0_12] : memref<8x4761xf32, #tpu.memory_space<vmem>>, vector<8x4761xf32>
    tpu.vector_store %arg6[%c0_11, %c0_12], %14 {strides = array<i32>} : memref<8x4761xf32, #tpu.memory_space<vmem>>, vector<8x4761xf32>,
    return
  }
  func.func @transform_0(%arg0: i32) -> (i32, i32) {
    %c0_i32 = arith.constant 0 : i32
    %c0_i32_0 = arith.constant 0 : i32
    return %arg0, %c0_i32 : i32, i32
  }
  func.func @transform_1(%arg0: i32) -> (i32, i32) {
    %c0_i32 = arith.constant 0 : i32
    %c0_i32_0 = arith.constant 0 : i32
    %c0_i32_1 = arith.constant 0 : i32
    return %c0_i32, %c0_i32_0 : i32, i32
  }
  func.func @transform_2(%arg0: i32) -> (i32, i32) {
    %c0_i32 = arith.constant 0 : i32
    %c0_i32_0 = arith.constant 0 : i32
    %c0_i32_1 = arith.constant 0 : i32
    return %c0_i32, %c0_i32_0 : i32, i32
  }
  func.func @transform_3(%arg0: i32) -> (i32, i32) {
    %c0_i32 = arith.constant 0 : i32
    %c0_i32_0 = arith.constant 0 : i32
    %c0_i32_1 = arith.constant 0 : i32
    return %c0_i32, %c0_i32_0 : i32, i32
  }
  func.func @transform_4(%arg0: i32) -> (i32, i32) {
    %c0_i32 = arith.constant 0 : i32
    %c0_i32_0 = arith.constant 0 : i32
    %c0_i32_1 = arith.constant 0 : i32
    return %c0_i32, %c0_i32_0 : i32, i32
  }
  func.func @transform_5(%arg0: i32) -> (i32, i32) {
    %c0_i32 = arith.constant 0 : i32
    %c0_i32_0 = arith.constant 0 : i32
    return %arg0, %c0_i32 : i32, i32
  }
}

</mosaic_0001>

<bundles_post_ra>
// kernel: sparse_autoencoder_forward.1
= control target key start
LH: loop header
LB: loop body
LE: loop exit
PB: predicated region body
PF: predicated region fallthrough
CT: control target
= control target key end

     0   :  { %s8175_s18 = smov 0   ;;  %s10272_s0 = inlined_call_operand.vmem [shape: f32[16,4761], index: 0, kind: input, shape index: {}]   ;;  %s10273_s1 = inlined_call_operand.vmem [shape: bf16[4761,128], index: 1, kind: input, shape index: {}]   ;;  %s10274_s2 = inlined_call_operand.vmem [shape: f32[1,128], index: 2, kind: input, shape index: {}]   ;;  %s10275_s3 = inlined_call_operand.vmem [shape: bf16[128,4761], index: 3, kind: input, shape index: {}]   ;;  %s10276_s4 = inlined_call_operand.vmem [shape: f32[1,4761], index: 4, kind: input, shape index: {}]   ;;  %s10277_s5 = inlined_call_operand.vmem [shape: f32[16,4761], index: 5, kind: output, shape index: {}]  }
   0x1 LB: > { %s6361_s19 = sadd.s32 4294967295, %s8141_s18   ;;  %p6365_p0 = scmp.ge.s32.totalorder %s8141_s18, 1  ;;  %s8141_s18 = sphi %s8175_s18, %s15_s18  }
   0x2   : > { %p187_p1 = scmp.lt.s32.totalorder %s8141_s18, 3 }
   0x4   : > { %p188_p2 = pnand %p6365_p0, %p187_p1 }
   0x5   : > { %v7381_v0 = vld [vmem:[%s10273_s1 + $0x40] sm:$0xff] (!%p188_p2)   ;;  %v7385_v4 = vld [vmem:[%s10273_s1 + $0x48] sm:$0xff] (!%p188_p2)   ;;  %v7389_v8 = vld [vmem:[%s10273_s1 + $0x50] sm:$0xff] (!%p188_p2)   ;;  %p215_p3 = scmp.lt.s32.totalorder (!%p188_p2), %s6361_s19, 1  ;;  %vm2692_vm0 = vcmask (!%p188_p2), 203776   ;;  %vm2696_vm1 = vcmask (!%p188_p2), 1043456  }
   0x6   : > { %191 = sbr.rel (%p188_p2) target bundleno = 1056 (0x420), region = 40  ;;  %v7382_v1 = vld [vmem:[%s10273_s1] sm:$0xff] (!%p188_p2)   ;;  %6974 = vmatprep.subr.bf16.mxu0 (!%p188_p2), %v7381_v0  ;;  %v7386_v5 = vld [vmem:[%s10273_s1 + $0x8] sm:$0xff] (!%p188_p2)   ;;  %v7390_v9 = vld [vmem:[%s10273_s1 + $0x10] sm:$0xff] (!%p188_p2)   ;;  %vm2697_vm2 = vcmask (!%p188_p2), 1044480  }
   0x7   : > { %v7383_v2 = vld [vmem:[%s10273_s1 + $0xc0] sm:$0xff] (!%p188_p2)   ;;  %6975 = vmatpush3.bf16.msra.mxu0 (!%p188_p2), %v7382_v1  ;;  %v7387_v6 = vld [vmem:[%s10273_s1 + $0xc8] sm:$0xff] (!%p188_p2)   ;;  %v7391_v10 = vld [vmem:[%s10273_s1 + $0xd0] sm:$0xff] (!%p188_p2)  }
   0x8   : > { %v7384_v3 = vld [vmem:[%s10273_s1 + $0x80] sm:$0xff] (!%p188_p2)   ;;  %6996 = vmatprep.subr.bf16.mxu1 (!%p188_p2), %v7383_v2  ;;  %6976 = vmatprep.subr.bf16.mxu0 (!%p188_p2), %v7385_v4  ;;  %v7388_v7 = vld [vmem:[%s10273_s1 + $0x88] sm:$0xff] (!%p188_p2)   ;;  %v7392_v11 = vld [vmem:[%s10273_s1 + $0x90] sm:$0xff] (!%p188_p2)  }
   0x9   : > { %6997 = vmatpush3.bf16.msra.mxu1 (!%p188_p2), %v7384_v3  ;;  %v7393_v12 = vld [vmem:[%s10273_s1 + $0x58] sm:$0xff] (!%p188_p2)   ;;  %v7397_v16 = vld [vmem:[%s10273_s1 + $0x60] sm:$0xff] (!%p188_p2)   ;;  %v7401_v20 = vld [vmem:[%s10273_s1 + $0x68] sm:$0xff] (!%p188_p2)  }
   0xa   : > { %6998 = vmatprep.subr.bf16.mxu1 (!%p188_p2), %v7387_v6  ;;  %v7394_v13 = vld [vmem:[%s10273_s1 + $0x18] sm:$0xff] (!%p188_p2)   ;;  %v7398_v17 = vld [vmem:[%s10273_s1 + $0x20] sm:$0xff] (!%p188_p2)   ;;  %v7402_v21 = vld [vmem:[%s10273_s1 + $0x28] sm:$0xff] (!%p188_p2)  }
   0xb   : > { %6977 = vmatpush3.bf16.msra.mxu0 (!%p188_p2), %v7386_v5  ;;  %v7395_v14 = vld [vmem:[%s10273_s1 + $0xd8] sm:$0xff] (!%p188_p2)   ;;  %v7399_v18 = vld [vmem:[%s10273_s1 + $0xe0] sm:$0xff] (!%p188_p2)   ;;  %v7403_v22 = vld [vmem:[%s10273_s1 + $0xe8] sm:$0xff] (!%p188_p2)  }
   0xc   : > { %6978 = vmatprep.subr.bf16.mxu0 (!%p188_p2), %v7389_v8  ;;  %v7396_v15 = vld [vmem:[%s10273_s1 + $0x98] sm:$0xff] (!%p188_p2)   ;;  %v7400_v19 = vld [vmem:[%s10273_s1 + $0xa0] sm:$0xff] (!%p188_p2)   ;;  %v7404_v23 = vld [vmem:[%s10273_s1 + $0xa8] sm:$0xff] (!%p188_p2)  }
   0xd   : > { %6999 = vmatpush3.bf16.msra.mxu1 %v7388_v7  ;;  %s10279_s19 = smov (!%p215_p3, %s6361_s19), 1  ;;  %v7405_v24 = vld [vmem:[%s10273_s1 + $0x70] sm:$0xff]   ;;  %v7409_v28 = vld [vmem:[%s10273_s1 + $0x78] sm:$0xff]   ;;  %v7413_v36 = vld [vmem:[%s10273_s1 + $0x140] sm:$0xff]  }
   0xe   : > { %7000 = vmatprep.subr.bf16.mxu1 %v7391_v10  ;;  %s7370_s24 = smul.u32 304, %s10279_s19  ;;  %v7406_v25 = vld [vmem:[%s10273_s1 + $0x30] sm:$0xff]   ;;  %v7410_v29 = vld [vmem:[%s10273_s1 + $0x38] sm:$0xff]   ;;  %v7414_v39 = vld [vmem:[%s10273_s1 + $0x100] sm:$0xff]  }
   0xf   : > { %6979 = vmatpush3.bf16.msra.mxu0 %v7390_v9  ;;  %v7407_v26 = vld [vmem:[%s10273_s1 + $0xf0] sm:$0xff]   ;;  %v7411_v30 = vld [vmem:[%s10273_s1 + $0xf8] sm:$0xff]   ;;  %v7415_v42 = vld [vmem:[%s10273_s1 + $0x1c0] sm:$0xff]  }
  0x10   : > { %6980 = vmatprep.subr.bf16.mxu0 %v7393_v12  ;;  %v7408_v27 = vld [vmem:[%s10273_s1 + $0xb0] sm:$0xff]   ;;  %s8282_s10 = scalar_lea.vmem %s10272_s0, %s7370_s24  ;;  %v7412_v33 = vld [vmem:[%s10273_s1 + $0xb8] sm:$0xff]   ;;  %v7416_v43 = vld [vmem:[%s10273_s1 + $0x180] sm:$0xff]   ;;  %s9966_s27 = scalar_lea.vmem %s10277_s5, %s7370_s24 }
  0x11   : > { %7001 = vmatpush3.bf16.msra.mxu1 %v7392_v11  ;;  %v227_v31 = vld [vmem:[%s8282_s10 + $0x8] sm:$0xff]  ;;  %v226_v34 = vld [vmem:[%s8282_s10] sm:$0xff]  ;;  %v229_v37 = vld [vmem:[%s8282_s10 + $0x18] sm:$0xff] }
  0x12   : > { %7002 = vmatprep.subr.bf16.mxu1 %v7395_v14  ;;  %v265_v32 = vpack.c.bf16 %v227_v31, %v227_v31  ;;  %v264_v35 = vpack.c.bf16 %v226_v34, %v226_v34  ;;  %v267_v38 = vpack.c.bf16 %v229_v37, %v229_v37  ;;  %v228_v40 = vld [vmem:[%s8282_s10 + $0x10] sm:$0xff]  ;;  %v7417_v44 = vld [vmem:[%s10273_s1 + $0x148] sm:$0xff]   ;;  %v7425_v52 = vld [vmem:[%s10273_s1 + $0x158] sm:$0xff]  }
  0x13   : > { %6981 = vmatpush3.bf16.msra.mxu0 %v7394_v13  ;;  %v266_v41 = vpack.c.bf16 %v228_v40, %v228_v40  ;;  %v7418_v45 = vld [vmem:[%s10273_s1 + $0x108] sm:$0xff]   ;;  %v7421_v48 = vld [vmem:[%s10273_s1 + $0x150] sm:$0xff]   ;;  %v7426_v53 = vld [vmem:[%s10273_s1 + $0x118] sm:$0xff]  }
  0x14   : > { %6982 = vmatprep.subr.bf16.mxu0 %v7397_v16  ;;  %2735 = vmatprep.mubr.bf16.mxu0 %v265_v32  ;;  %v7419_v46 = vld [vmem:[%s10273_s1 + $0x1c8] sm:$0xff]   ;;  %v7422_v49 = vld [vmem:[%s10273_s1 + $0x110] sm:$0xff]   ;;  %v7427_v54 = vld [vmem:[%s10273_s1 + $0x1d8] sm:$0xff]  }
  0x15   : > { %7003 = vmatpush3.bf16.msra.mxu1 %v7396_v15  ;;  %2775 = vmatprep.mubr.bf16.mxu1 %v267_v38  ;;  %v7420_v47 = vld [vmem:[%s10273_s1 + $0x188] sm:$0xff]   ;;  %v7423_v50 = vld [vmem:[%s10273_s1 + $0x1d0] sm:$0xff]   ;;  %v7428_v55 = vld [vmem:[%s10273_s1 + $0x198] sm:$0xff]  }
  0x16   : > { %7004 = vmatprep.subr.bf16.mxu1 %v7399_v18  ;;  %v7424_v51 = vld [vmem:[%s10273_s1 + $0x190] sm:$0xff]   ;;  %v7429_v56 = vld [vmem:[%s10273_s1 + $0x160] sm:$0xff]   ;;  %v7433_v60 = vld [vmem:[%s10273_s1 + $0x168] sm:$0xff]  }
  0x17   : > { %6983 = vmatpush3.bf16.msra.mxu0 %v7398_v17  ;;  %v7430_v57 = vld [vmem:[%s10273_s1 + $0x120] sm:$0xff]   ;;  %v7434_v61 = vld [vmem:[%s10273_s1 + $0x128] sm:$0xff]   ;;  %v7437_v0 = vld [vmem:[%s10273_s1 + $0x170] sm:$0xff]  }
  0x18   : > { %6984 = vmatprep.subr.bf16.mxu0 %v7401_v20  ;;  %v7431_v58 = vld [vmem:[%s10273_s1 + $0x1e0] sm:$0xff]   ;;  %v7435_v62 = vld [vmem:[%s10273_s1 + $0x1e8] sm:$0xff]   ;;  %v7438_v1 = vld [vmem:[%s10273_s1 + $0x130] sm:$0xff]  }
  0x19   : > { %7005 = vmatpush3.bf16.msra.mxu1 %v7400_v19  ;;  %v7432_v59 = vld [vmem:[%s10273_s1 + $0x1a0] sm:$0xff]   ;;  %v7436_v63 = vld [vmem:[%s10273_s1 + $0x1a8] sm:$0xff]   ;;  %v7439_v2 = vld [vmem:[%s10273_s1 + $0x1f0] sm:$0xff]  }
  0x1a   : > { %7006 = vmatprep.subr.bf16.mxu1 %v7403_v22  ;;  %v7440_v3 = vld [vmem:[%s10273_s1 + $0x1b0] sm:$0xff]   ;;  %v7441_v4 = vld [vmem:[%s10273_s1 + $0x178] sm:$0xff]   ;;  %v231_v7 = vld [vmem:[%s8282_s10 + $0x28] sm:$0xff] }
  0x1b   : > { %6985 = vmatpush3.bf16.msra.mxu0 %v7402_v21  ;;  %v7442_v5 = vld [vmem:[%s10273_s1 + $0x138] sm:$0xff]   ;;  %v269_v8 = vpack.c.bf16 %v231_v7, %v231_v7  ;;  %v230_v10 = vld [vmem:[%s8282_s10 + $0x20] sm:$0xff]  ;;  %v232_v16 = vld [vmem:[%s8282_s10 + $0x30] sm:$0xff] }
  0x1c   : > { %6986 = vmatprep.subr.bf16.mxu0 %v7405_v24  ;;  %v7443_v6 = vld [vmem:[%s10273_s1 + $0x1f8] sm:$0xff]   ;;  %v268_v11 = vpack.c.bf16 %v230_v10, %v230_v10  ;;  %v7445_v12 = vld [vmem:[%s10273_s1 + $0x240] sm:$0xff]   ;;  %v270_v17 = vpack.c.bf16 %v232_v16, %v232_v16  ;;  %v7449_v20 = vld [vmem:[%s10273_s1 + $0x248] sm:$0xff]  }
  0x1d   : > { %7007 = vmatpush3.bf16.msra.mxu1 %v7404_v23  ;;  %v7444_v9 = vld [vmem:[%s10273_s1 + $0x1b8] sm:$0xff]   ;;  %v7446_v15 = vld [vmem:[%s10273_s1 + $0x200] sm:$0xff]   ;;  %v7450_v21 = vld [vmem:[%s10273_s1 + $0x208] sm:$0xff]  }
  0x1e   : > { %7008 = vmatprep.subr.bf16.mxu1 %v7407_v26  ;;  %v233_v13 = vld [vmem:[%s8282_s10 + $0x38] sm:$0xff]  ;;  %v7447_v18 = vld [vmem:[%s10273_s1 + $0x2c0] sm:$0xff]   ;;  %v7451_v22 = vld [vmem:[%s10273_s1 + $0x2c8] sm:$0xff]  }
  0x1f   : > { %6987 = vmatpush3.bf16.msra.mxu0 %v7406_v25  ;;  %v271_v14 = vpack.c.bf16 %v233_v13, %v233_v13  ;;  %v7448_v19 = vld [vmem:[%s10273_s1 + $0x280] sm:$0xff]   ;;  %v7452_v23 = vld [vmem:[%s10273_s1 + $0x288] sm:$0xff]   ;;  %v7453_v24 = vld [vmem:[%s10273_s1 + $0x250] sm:$0xff]  }
  0x20   : > { %6988 = vmatprep.subr.bf16.mxu0 %v7409_v28  ;;  %v7454_v25 = vld [vmem:[%s10273_s1 + $0x210] sm:$0xff]   ;;  %v7457_v28 = vld [vmem:[%s10273_s1 + $0x258] sm:$0xff]   ;;  %v7461_v32 = vld [vmem:[%s10273_s1 + $0x260] sm:$0xff]  }
  0x21   : > { %7009 = vmatpush3.bf16.msra.mxu1 %v7408_v27  ;;  %v7455_v26 = vld [vmem:[%s10273_s1 + $0x2d0] sm:$0xff]   ;;  %v7460_v31 = vld [vmem:[%s10273_s1 + $0x298] sm:$0xff]   ;;  %v7463_v34 = vld [vmem:[%s10273_s1 + $0x2e0] sm:$0xff]  }
  0x22   : > { %7010 = vmatprep.subr.bf16.mxu1 %v7411_v30  ;;  %v7456_v27 = vld [vmem:[%s10273_s1 + $0x290] sm:$0xff]   ;;  %v7459_v30 = vld [vmem:[%s10273_s1 + $0x2d8] sm:$0xff]   ;;  %v7466_v37 = vld [vmem:[%s10273_s1 + $0x228] sm:$0xff]  }
  0x23   : > { %6989 = vmatpush3.bf16.msra.mxu0 %v7410_v29  ;;  %v7458_v29 = vld [vmem:[%s10273_s1 + $0x218] sm:$0xff]   ;;  %v7467_v38 = vld [vmem:[%s10273_s1 + $0x2e8] sm:$0xff]   ;;  %v7469_v40 = vld [vmem:[%s10273_s1 + $0x270] sm:$0xff]  }
  0x24   : > { %7018 = vmatprep.subr.bf16.mxu0 %v7413_v36  ;;  %v7465_v36 = vld [vmem:[%s10273_s1 + $0x268] sm:$0xff]   ;;  %v7492_v7 = vld [vmem:[%s10273_s1 + $0x398] sm:$0xff]   ;;  %v7495_v10 = vld [vmem:[%s10273_s1 + $0x3e0] sm:$0xff]  }
  0x25   : > { %7011 = vmatpush3.bf16.msra.mxu1 %v7412_v33  ;;  %v7462_v33 = vld [vmem:[%s10273_s1 + $0x220] sm:$0xff]   ;;  %v7498_v13 = vld [vmem:[%s10273_s1 + $0x328] sm:$0xff]   ;;  %v7501_v16 = vld [vmem:[%s10273_s1 + $0x370] sm:$0xff]  }
  0x26   : > { %2736 = vmatmul.mubr.bf16.vlgmr.msra.gmra.mrb[0].mxu0 %v264_v35  ;;  %7040 = vmatprep.subr.bf16.mxu1 %v7415_v42  ;;  %v7464_v35 = vld [vmem:[%s10273_s1 + $0x2a0] sm:$0xff]   ;;  %v7471_v42 = vld [vmem:[%s10273_s1 + $0x2f0] sm:$0xff]  }
  0x27   : > { %7019 = vmatpush3.bf16.msra.mxu0 %v7414_v39  ;;  %2815 = vmatprep.mubr.bf16.mxu0 %v269_v8  ;;  %v7468_v39 = vld [vmem:[%s10273_s1 + $0x2a8] sm:$0xff]   ;;  %v7493_v8 = vld [vmem:[%s10273_s1 + $0x360] sm:$0xff]  }
  0x28   : > { %2776 = vmatmul.mubr.bf16.vlgmr.msra.gmra.mrb[0].mxu1 %v266_v41  ;;  %7020 = vmatprep.subr.bf16.mxu0 %v7417_v44  ;;  %v7470_v41 = vld [vmem:[%s10273_s1 + $0x230] sm:$0xff]   ;;  %v7473_v44 = vld [vmem:[%s10273_s1 + $0x278] sm:$0xff]  }
  0x29   : > { %7041 = vmatpush3.bf16.msra.mxu1 %v7416_v43  ;;  %2855 = vmatprep.mubr.bf16.mxu1 %v271_v14  ;;  %v7472_v43 = vld [vmem:[%s10273_s1 + $0x2b0] sm:$0xff]   ;;  %v7499_v14 = vld [vmem:[%s10273_s1 + $0x3e8] sm:$0xff]  }
  0x2a   : > { %7042 = vmatprep.subr.bf16.mxu1 %v7419_v46  ;;  %v7475_v46 = vld [vmem:[%s10273_s1 + $0x2f8] sm:$0xff]  }
  0x2b   : > { %7021 = vmatpush3.bf16.msra.mxu0 %v7418_v45  ;;  %v7474_v45 = vld [vmem:[%s10273_s1 + $0x238] sm:$0xff]  }
  0x2c   : > { %7022 = vmatprep.subr.bf16.mxu0 %v7421_v48 }
  0x2d   : > { %7043 = vmatpush3.bf16.msra.mxu1 %v7420_v47  ;;  %v235_v47 = vld [vmem:[%s8282_s10 + $0x48] sm:$0xff] }
  0x2e   : > { %7044 = vmatprep.subr.bf16.mxu1 %v7423_v50  ;;  %v273_v48 = vpack.c.bf16 %v235_v47, %v235_v47  ;;  %v234_v50 = vld [vmem:[%s8282_s10 + $0x40] sm:$0xff]  ;;  %v7524_v47 = vld [vmem:[%s10273_s1 + $0x498] sm:$0xff]  }
  0x2f   : > { %7023 = vmatpush3.bf16.msra.mxu0 %v7422_v49  ;;  %v7476_v49 = vld [vmem:[%s10273_s1 + $0x2b8] sm:$0xff]  }
  0x30   : > { %7024 = vmatprep.subr.bf16.mxu0 %v7425_v52  ;;  %v7477_v52 = vld [vmem:[%s10273_s1 + $0x340] sm:$0xff]  }
  0x31   : > { %7045 = vmatpush3.bf16.msra.mxu1 %v7424_v51  ;;  %v272_v51 = vpack.c.bf16 %v234_v50, %v234_v50  ;;  %v7527_v50 = vld [vmem:[%s10273_s1 + $0x4e0] sm:$0xff]  }
  0x32   : > { %7046 = vmatprep.subr.bf16.mxu1 %v7427_v54 }
  0x33   : > { %7025 = vmatpush3.bf16.msra.mxu0 %v7426_v53  ;;  %v237_v53 = vld [vmem:[%s8282_s10 + $0x58] sm:$0xff] }
  0x34   : > { %7026 = vmatprep.subr.bf16.mxu0 %v7429_v56  ;;  %v275_v54 = vpack.c.bf16 %v237_v53, %v237_v53  ;;  %v236_v56 = vld [vmem:[%s8282_s10 + $0x50] sm:$0xff]  ;;  %v7530_v53 = vld [vmem:[%s10273_s1 + $0x428] sm:$0xff]  }
  0x35   : > { %7047 = vmatpush3.bf16.msra.mxu1 %v7428_v55  ;;  %v7478_v55 = vld [vmem:[%s10273_s1 + $0x300] sm:$0xff]  }
  0x36   : > { %7048 = vmatprep.subr.bf16.mxu1 %v7431_v58  ;;  %v7479_v58 = vld [vmem:[%s10273_s1 + $0x3c0] sm:$0xff]  }
  0x37   : > { %7027 = vmatpush3.bf16.msra.mxu0 %v7430_v57  ;;  %v274_v57 = vpack.c.bf16 %v236_v56, %v236_v56  ;;  %v7533_v56 = vld [vmem:[%s10273_s1 + $0x470] sm:$0xff]  }
  0x38   : > { %7028 = vmatprep.subr.bf16.mxu0 %v7433_v60  ;;  %v7481_v60 = vld [vmem:[%s10273_s1 + $0x348] sm:$0xff]  }
  0x39   : > { %7049 = vmatpush3.bf16.msra.mxu1 %v7432_v59  ;;  %v7480_v59 = vld [vmem:[%s10273_s1 + $0x380] sm:$0xff]  }
  0x3a   : > { %7050 = vmatprep.subr.bf16.mxu1 %v7435_v62  ;;  %v7483_v62 = vld [vmem:[%s10273_s1 + $0x3c8] sm:$0xff]  }
  0x3b   : > { %7029 = vmatpush3.bf16.msra.mxu0 %v7434_v61  ;;  %v7482_v61 = vld [vmem:[%s10273_s1 + $0x308] sm:$0xff]  }
  0x3c   : > { %7030 = vmatprep.subr.bf16.mxu0 %v7437_v0  ;;  %v7485_v0 = vld [vmem:[%s10273_s1 + $0x350] sm:$0xff]  }
  0x3d   : > { %7051 = vmatpush3.bf16.msra.mxu1 %v7436_v63  ;;  %v7484_v63 = vld [vmem:[%s10273_s1 + $0x388] sm:$0xff]  }
  0x3e   : > { %7052 = vmatprep.subr.bf16.mxu1 %v7439_v2  ;;  %v7487_v2 = vld [vmem:[%s10273_s1 + $0x3d0] sm:$0xff]  }
  0x3f   : > { %7031 = vmatpush3.bf16.msra.mxu0 %v7438_v1  ;;  %v7486_v1 = vld [vmem:[%s10273_s1 + $0x310] sm:$0xff]  }
  0x40   : > { %7032 = vmatprep.subr.bf16.mxu0 %v7441_v4  ;;  %v7489_v4 = vld [vmem:[%s10273_s1 + $0x358] sm:$0xff]  }
  0x41   : > { %7053 = vmatpush3.bf16.msra.mxu1 %v7440_v3  ;;  %v7488_v3 = vld [vmem:[%s10273_s1 + $0x390] sm:$0xff]  }
  0x42   : > { %7054 = vmatprep.subr.bf16.mxu1 %v7443_v6  ;;  %v7491_v6 = vld [vmem:[%s10273_s1 + $0x3d8] sm:$0xff]  }
  0x43   : > { %7033 = vmatpush3.bf16.msra.mxu0 %v7442_v5  ;;  %v7490_v5 = vld [vmem:[%s10273_s1 + $0x318] sm:$0xff]  }
  0x44   : > { %7062 = vmatprep.subr.bf16.mxu0 %v7445_v12  ;;  %v7497_v12 = vld [vmem:[%s10273_s1 + $0x368] sm:$0xff]  }
  0x45   : > { %7055 = vmatpush3.bf16.msra.mxu1 %v7444_v9  ;;  %v7494_v9 = vld [vmem:[%s10273_s1 + $0x320] sm:$0xff]  }
  0x46   : > { %2816 = vmatmul.mubr.bf16.vlgmr.msra.gmra.mrb[4].mxu0 %v268_v11  ;;  %7084 = vmatprep.subr.bf16.mxu1 %v7447_v18  ;;  %v7496_v11 = vld [vmem:[%s10273_s1 + $0x3a0] sm:$0xff]   ;;  %v7503_v18 = vld [vmem:[%s10273_s1 + $0x3f0] sm:$0xff]  }
  0x47   : > { %7063 = vmatpush3.bf16.msra.mxu0 %v7446_v15  ;;  %2895 = vmatprep.mubr.bf16.mxu0 %v273_v48  ;;  %v7500_v15 = vld [vmem:[%s10273_s1 + $0x3a8] sm:$0xff]   ;;  %v7525_v48 = vld [vmem:[%s10273_s1 + $0x460] sm:$0xff]  }
  0x48   : > { %2856 = vmatmul.mubr.bf16.vlgmr.msra.gmra.mrb[4].mxu1 %v270_v17  ;;  %7064 = vmatprep.subr.bf16.mxu0 %v7449_v20  ;;  %v7502_v17 = vld [vmem:[%s10273_s1 + $0x330] sm:$0xff]   ;;  %v7505_v20 = vld [vmem:[%s10273_s1 + $0x378] sm:$0xff]  }
  0x49   : > { %7085 = vmatpush3.bf16.msra.mxu1 %v7448_v19  ;;  %2935 = vmatprep.mubr.bf16.mxu1 %v275_v54  ;;  %v7504_v19 = vld [vmem:[%s10273_s1 + $0x3b0] sm:$0xff]   ;;  %v7531_v54 = vld [vmem:[%s10273_s1 + $0x4e8] sm:$0xff]  }
  0x4a   : > { %7086 = vmatprep.subr.bf16.mxu1 %v7451_v22  ;;  %v7507_v22 = vld [vmem:[%s10273_s1 + $0x3f8] sm:$0xff]  }
  0x4b   : > { %7065 = vmatpush3.bf16.msra.mxu0 %v7450_v21  ;;  %v7506_v21 = vld [vmem:[%s10273_s1 + $0x338] sm:$0xff]  }
  0x4c   : > { %7066 = vmatprep.subr.bf16.mxu0 %v7453_v24 }
  0x4d   : > { %7087 = vmatpush3.bf16.msra.mxu1 %v7452_v23  ;;  %v239_v23 = vld [vmem:[%s8282_s10 + $0x68] sm:$0xff] }
  0x4e   : > { %7088 = vmatprep.subr.bf16.mxu1 %v7455_v26  ;;  %v277_v24 = vpack.c.bf16 %v239_v23, %v239_v23  ;;  %v238_v26 = vld [vmem:[%s8282_s10 + $0x60] sm:$0xff]  ;;  %v7556_v23 = vld [vmem:[%s10273_s1 + $0x598] sm:$0xff]  }
  0x4f   : > { %7067 = vmatpush3.bf16.msra.mxu0 %v7454_v25  ;;  %v7508_v25 = vld [vmem:[%s10273_s1 + $0x3b8] sm:$0xff]  }
  0x50   : > { %7068 = vmatprep.subr.bf16.mxu0 %v7457_v28  ;;  %v7509_v28 = vld [vmem:[%s10273_s1 + $0x440] sm:$0xff]  }
  0x51   : > { %7089 = vmatpush3.bf16.msra.mxu1 %v7456_v27  ;;  %v276_v27 = vpack.c.bf16 %v238_v26, %v238_v26  ;;  %v7559_v26 = vld [vmem:[%s10273_s1 + $0x5e0] sm:$0xff]  }
  0x52   : > { %7090 = vmatprep.subr.bf16.mxu1 %v7459_v30 }
  0x53   : > { %7069 = vmatpush3.bf16.msra.mxu0 %v7458_v29  ;;  %v241_v29 = vld [vmem:[%s8282_s10 + $0x78] sm:$0xff] }
  0x54   : > { %7070 = vmatprep.subr.bf16.mxu0 %v7461_v32  ;;  %v279_v30 = vpack.c.bf16 %v241_v29, %v241_v29  ;;  %v240_v32 = vld [vmem:[%s8282_s10 + $0x70] sm:$0xff]  ;;  %v7562_v29 = vld [vmem:[%s10273_s1 + $0x528] sm:$0xff]  }
  0x55   : > { %7091 = vmatpush3.bf16.msra.mxu1 %v7460_v31  ;;  %v7510_v31 = vld [vmem:[%s10273_s1 + $0x400] sm:$0xff]  }
  0x56   : > { %7092 = vmatprep.subr.bf16.mxu1 %v7463_v34  ;;  %v7511_v34 = vld [vmem:[%s10273_s1 + $0x4c0] sm:$0xff]  }
  0x57   : > { %7071 = vmatpush3.bf16.msra.mxu0 %v7462_v33  ;;  %v278_v33 = vpack.c.bf16 %v240_v32, %v240_v32  ;;  %v7565_v32 = vld [vmem:[%s10273_s1 + $0x570] sm:$0xff]  }
  0x58   : > { %7072 = vmatprep.subr.bf16.mxu0 %v7465_v36  ;;  %v7513_v36 = vld [vmem:[%s10273_s1 + $0x448] sm:$0xff]  }
  0x59   : > { %7093 = vmatpush3.bf16.msra.mxu1 %v7464_v35  ;;  %v7512_v35 = vld [vmem:[%s10273_s1 + $0x480] sm:$0xff]  }
  0x5a   : > { %7094 = vmatprep.subr.bf16.mxu1 %v7467_v38  ;;  %v7515_v38 = vld [vmem:[%s10273_s1 + $0x4c8] sm:$0xff]  }
  0x5b   : > { %7073 = vmatpush3.bf16.msra.mxu0 %v7466_v37  ;;  %v7514_v37 = vld [vmem:[%s10273_s1 + $0x408] sm:$0xff]  }
  0x5c   : > { %7074 = vmatprep.subr.bf16.mxu0 %v7469_v40  ;;  %v7517_v40 = vld [vmem:[%s10273_s1 + $0x450] sm:$0xff]  }
  0x5d   : > { %7095 = vmatpush3.bf16.msra.mxu1 %v7468_v39  ;;  %v7516_v39 = vld [vmem:[%s10273_s1 + $0x488] sm:$0xff]  }
  0x5e   : > { %7096 = vmatprep.subr.bf16.mxu1 %v7471_v42  ;;  %v7519_v42 = vld [vmem:[%s10273_s1 + $0x4d0] sm:$0xff]  }
  0x5f   : > { %7075 = vmatpush3.bf16.msra.mxu0 %v7470_v41  ;;  %v7518_v41 = vld [vmem:[%s10273_s1 + $0x410] sm:$0xff]  }
  0x60   : > { %7076 = vmatprep.subr.bf16.mxu0 %v7473_v44  ;;  %v7521_v44 = vld [vmem:[%s10273_s1 + $0x458] sm:$0xff]  }
  0x61   : > { %7097 = vmatpush3.bf16.msra.mxu1 %v7472_v43  ;;  %v7520_v43 = vld [vmem:[%s10273_s1 + $0x490] sm:$0xff]  }
  0x62   : > { %7098 = vmatprep.subr.bf16.mxu1 %v7475_v46  ;;  %v7523_v46 = vld [vmem:[%s10273_s1 + $0x4d8] sm:$0xff]  }
  0x63   : > { %7077 = vmatpush3.bf16.msra.mxu0 %v7474_v45  ;;  %v7522_v45 = vld [vmem:[%s10273_s1 + $0x418] sm:$0xff]  }
  0x64   : > { %7106 = vmatprep.subr.bf16.mxu0 %v7477_v52  ;;  %v7529_v52 = vld [vmem:[%s10273_s1 + $0x468] sm:$0xff]  }
  0x65   : > { %7099 = vmatpush3.bf16.msra.mxu1 %v7476_v49  ;;  %v7526_v49 = vld [vmem:[%s10273_s1 + $0x420] sm:$0xff]  }
  0x66   : > { %2896 = vmatmul.mubr.bf16.vlgmr.msra.gmra.mrb[8].mxu0 %v272_v51  ;;  %7128 = vmatprep.subr.bf16.mxu1 %v7479_v58  ;;  %v7528_v51 = vld [vmem:[%s10273_s1 + $0x4a0] sm:$0xff]   ;;  %v7535_v58 = vld [vmem:[%s10273_s1 + $0x4f0] sm:$0xff]  }
  0x67   : > { %7107 = vmatpush3.bf16.msra.mxu0 %v7478_v55  ;;  %2975 = vmatprep.mubr.bf16.mxu0 %v277_v24  ;;  %v7532_v55 = vld [vmem:[%s10273_s1 + $0x4a8] sm:$0xff]   ;;  %v7557_v24 = vld [vmem:[%s10273_s1 + $0x560] sm:$0xff]  }
  0x68   : > { %2936 = vmatmul.mubr.bf16.vlgmr.msra.gmra.mrb[8].mxu1 %v274_v57  ;;  %7108 = vmatprep.subr.bf16.mxu0 %v7481_v60  ;;  %v7534_v57 = vld [vmem:[%s10273_s1 + $0x430] sm:$0xff]   ;;  %v7537_v60 = vld [vmem:[%s10273_s1 + $0x478] sm:$0xff]  }
  0x69   : > { %7129 = vmatpush3.bf16.msra.mxu1 %v7480_v59  ;;  %3015 = vmatprep.mubr.bf16.mxu1 %v279_v30  ;;  %v7536_v59 = vld [vmem:[%s10273_s1 + $0x4b0] sm:$0xff]   ;;  %v7563_v30 = vld [vmem:[%s10273_s1 + $0x5e8] sm:$0xff]  }
  0x6a   : > { %7130 = vmatprep.subr.bf16.mxu1 %v7483_v62  ;;  %v7539_v62 = vld [vmem:[%s10273_s1 + $0x4f8] sm:$0xff]  }
  0x6b   : > { %7109 = vmatpush3.bf16.msra.mxu0 %v7482_v61  ;;  %v7538_v61 = vld [vmem:[%s10273_s1 + $0x438] sm:$0xff]  }
  0x6c   : > { %7110 = vmatprep.subr.bf16.mxu0 %v7485_v0 }
  0x6d   : > { %7131 = vmatpush3.bf16.msra.mxu1 %v7484_v63  ;;  %v243_v63 = vld [vmem:[%s8282_s10 + $0x88] sm:$0xff] }
  0x6e   : > { %7132 = vmatprep.subr.bf16.mxu1 %v7487_v2  ;;  %v281_v0 = vpack.c.bf16 %v243_v63, %v243_v63  ;;  %v242_v2 = vld [vmem:[%s8282_s10 + $0x80] sm:$0xff]  ;;  %v7588_v63 = vld [vmem:[%s10273_s1 + $0x698] sm:$0xff]  }
  0x6f   : > { %7111 = vmatpush3.bf16.msra.mxu0 %v7486_v1  ;;  %v7540_v1 = vld [vmem:[%s10273_s1 + $0x4b8] sm:$0xff]  }
  0x70   : > { %7112 = vmatprep.subr.bf16.mxu0 %v7489_v4  ;;  %v7541_v4 = vld [vmem:[%s10273_s1 + $0x540] sm:$0xff]  }
  0x71   : > { %7133 = vmatpush3.bf16.msra.mxu1 %v7488_v3  ;;  %v280_v3 = vpack.c.bf16 %v242_v2, %v242_v2  ;;  %v7591_v2 = vld [vmem:[%s10273_s1 + $0x6e0] sm:$0xff]  }
  0x72   : > { %7134 = vmatprep.subr.bf16.mxu1 %v7491_v6 }
  0x73   : > { %7113 = vmatpush3.bf16.msra.mxu0 %v7490_v5  ;;  %v245_v5 = vld [vmem:[%s8282_s10 + $0x98] sm:$0xff] }
  0x74   : > { %7114 = vmatprep.subr.bf16.mxu0 %v7493_v8  ;;  %v283_v6 = vpack.c.bf16 %v245_v5, %v245_v5  ;;  %v244_v8 = vld [vmem:[%s8282_s10 + $0x90] sm:$0xff]  ;;  %v7594_v5 = vld [vmem:[%s10273_s1 + $0x628] sm:$0xff]  }
  0x75   : > { %7135 = vmatpush3.bf16.msra.mxu1 %v7492_v7  ;;  %v7542_v7 = vld [vmem:[%s10273_s1 + $0x500] sm:$0xff]  }
  0x76   : > { %7136 = vmatprep.subr.bf16.mxu1 %v7495_v10  ;;  %v7543_v10 = vld [vmem:[%s10273_s1 + $0x5c0] sm:$0xff]  }
  0x77   : > { %7115 = vmatpush3.bf16.msra.mxu0 %v7494_v9  ;;  %v282_v9 = vpack.c.bf16 %v244_v8, %v244_v8  ;;  %v7597_v8 = vld [vmem:[%s10273_s1 + $0x670] sm:$0xff]  }
  0x78   : > { %7116 = vmatprep.subr.bf16.mxu0 %v7497_v12  ;;  %v7545_v12 = vld [vmem:[%s10273_s1 + $0x548] sm:$0xff]  }
  0x79   : > { %7137 = vmatpush3.bf16.msra.mxu1 %v7496_v11  ;;  %v7544_v11 = vld [vmem:[%s10273_s1 + $0x580] sm:$0xff]  }
  0x7a   : > { %7138 = vmatprep.subr.bf16.mxu1 %v7499_v14  ;;  %v7547_v14 = vld [vmem:[%s10273_s1 + $0x5c8] sm:$0xff]  }
  0x7b   : > { %7117 = vmatpush3.bf16.msra.mxu0 %v7498_v13  ;;  %v7546_v13 = vld [vmem:[%s10273_s1 + $0x508] sm:$0xff]  }
  0x7c   : > { %7118 = vmatprep.subr.bf16.mxu0 %v7501_v16  ;;  %v7549_v16 = vld [vmem:[%s10273_s1 + $0x550] sm:$0xff]  }
  0x7d   : > { %7139 = vmatpush3.bf16.msra.mxu1 %v7500_v15  ;;  %v7548_v15 = vld [vmem:[%s10273_s1 + $0x588] sm:$0xff]  }
  0x7e   : > { %7140 = vmatprep.subr.bf16.mxu1 %v7503_v18  ;;  %v7551_v18 = vld [vmem:[%s10273_s1 + $0x5d0] sm:$0xff]  }
  0x7f   : > { %7119 = vmatpush3.bf16.msra.mxu0 %v7502_v17  ;;  %v7550_v17 = vld [vmem:[%s10273_s1 + $0x510] sm:$0xff]  }
  0x80   : > { %7120 = vmatprep.subr.bf16.mxu0 %v7505_v20  ;;  %v7553_v20 = vld [vmem:[%s10273_s1 + $0x558] sm:$0xff]  }
  0x81   : > { %7141 = vmatpush3.bf16.msra.mxu1 %v7504_v19  ;;  %v7552_v19 = vld [vmem:[%s10273_s1 + $0x590] sm:$0xff]  }
  0x82   : > { %7142 = vmatprep.subr.bf16.mxu1 %v7507_v22  ;;  %v7555_v22 = vld [vmem:[%s10273_s1 + $0x5d8] sm:$0xff]  }
  0x83   : > { %7121 = vmatpush3.bf16.msra.mxu0 %v7506_v21  ;;  %v7554_v21 = vld [vmem:[%s10273_s1 + $0x518] sm:$0xff]  }
  0x84   : > { %7150 = vmatprep.subr.bf16.mxu0 %v7509_v28  ;;  %v7561_v28 = vld [vmem:[%s10273_s1 + $0x568] sm:$0xff]  }
  0x85   : > { %7143 = vmatpush3.bf16.msra.mxu1 %v7508_v25  ;;  %v7558_v25 = vld [vmem:[%s10273_s1 + $0x520] sm:$0xff]  }
  0x86   : > { %2976 = vmatmul.mubr.bf16.vlgmr.msra.gmra.mrb[12].mxu0 %v276_v27  ;;  %7172 = vmatprep.subr.bf16.mxu1 %v7511_v34  ;;  %v7560_v27 = vld [vmem:[%s10273_s1 + $0x5a0] sm:$0xff]   ;;  %v7567_v34 = vld [vmem:[%s10273_s1 + $0x5f0] sm:$0xff]  }
  0x87   : > { %7151 = vmatpush3.bf16.msra.mxu0 %v7510_v31  ;;  %3055 = vmatprep.mubr.bf16.mxu0 %v281_v0  ;;  %v7564_v31 = vld [vmem:[%s10273_s1 + $0x5a8] sm:$0xff]   ;;  %v7589_v0 = vld [vmem:[%s10273_s1 + $0x660] sm:$0xff]  }
  0x88   : > { %3016 = vmatmul.mubr.bf16.vlgmr.msra.gmra.mrb[12].mxu1 %v278_v33  ;;  %7152 = vmatprep.subr.bf16.mxu0 %v7513_v36  ;;  %v7566_v33 = vld [vmem:[%s10273_s1 + $0x530] sm:$0xff]   ;;  %v7569_v36 = vld [vmem:[%s10273_s1 + $0x578] sm:$0xff]  }
  0x89   : > { %7173 = vmatpush3.bf16.msra.mxu1 %v7512_v35  ;;  %3095 = vmatprep.mubr.bf16.mxu1 %v283_v6  ;;  %v7568_v35 = vld [vmem:[%s10273_s1 + $0x5b0] sm:$0xff]   ;;  %v7595_v6 = vld [vmem:[%s10273_s1 + $0x6e8] sm:$0xff]  }
  0x8a   : > { %7174 = vmatprep.subr.bf16.mxu1 %v7515_v38  ;;  %v7571_v38 = vld [vmem:[%s10273_s1 + $0x5f8] sm:$0xff]  }
  0x8b   : > { %7153 = vmatpush3.bf16.msra.mxu0 %v7514_v37  ;;  %v7570_v37 = vld [vmem:[%s10273_s1 + $0x538] sm:$0xff]  }
  0x8c   : > { %7154 = vmatprep.subr.bf16.mxu0 %v7517_v40 }
  0x8d   : > { %7175 = vmatpush3.bf16.msra.mxu1 %v7516_v39  ;;  %v247_v39 = vld [vmem:[%s8282_s10 + $0xa8] sm:$0xff] }
  0x8e   : > { %7176 = vmatprep.subr.bf16.mxu1 %v7519_v42  ;;  %v285_v40 = vpack.c.bf16 %v247_v39, %v247_v39  ;;  %v246_v42 = vld [vmem:[%s8282_s10 + $0xa0] sm:$0xff] }
  0x8f   : > { %7155 = vmatpush3.bf16.msra.mxu0 %v7518_v41  ;;  %v7572_v41 = vld [vmem:[%s10273_s1 + $0x5b8] sm:$0xff]  }
  0x90   : > { %7156 = vmatprep.subr.bf16.mxu0 %v7521_v44  ;;  %v7573_v44 = vld [vmem:[%s10273_s1 + $0x640] sm:$0xff]  }
  0x91   : > { %7177 = vmatpush3.bf16.msra.mxu1 %v7520_v43  ;;  %v284_v43 = vpack.c.bf16 %v246_v42, %v246_v42 }
  0x92   : > { %7178 = vmatprep.subr.bf16.mxu1 %v7523_v46 }
  0x93   : > { %7157 = vmatpush3.bf16.msra.mxu0 %v7522_v45  ;;  %v249_v45 = vld [vmem:[%s8282_s10 + $0xb8] sm:$0xff] }
  0x94   : > { %7158 = vmatprep.subr.bf16.mxu0 %v7525_v48  ;;  %v287_v46 = vpack.c.bf16 %v249_v45, %v249_v45  ;;  %v248_v48 = vld [vmem:[%s8282_s10 + $0xb0] sm:$0xff]  ;;  %v7621_v45 = vld [vmem:[%s10273_s1 + $0x760] sm:$0xff]  }
  0x95   : > { %7179 = vmatpush3.bf16.msra.mxu1 %v7524_v47  ;;  %v7574_v47 = vld [vmem:[%s10273_s1 + $0x600] sm:$0xff]  }
  0x96   : > { %7180 = vmatprep.subr.bf16.mxu1 %v7527_v50  ;;  %v7575_v50 = vld [vmem:[%s10273_s1 + $0x6c0] sm:$0xff]  }
  0x97   : > { %7159 = vmatpush3.bf16.msra.mxu0 %v7526_v49  ;;  %v286_v49 = vpack.c.bf16 %v248_v48, %v248_v48 }
  0x98   : > { %7160 = vmatprep.subr.bf16.mxu0 %v7529_v52  ;;  %v7577_v52 = vld [vmem:[%s10273_s1 + $0x648] sm:$0xff]  }
  0x99   : > { %7181 = vmatpush3.bf16.msra.mxu1 %v7528_v51  ;;  %v7576_v51 = vld [vmem:[%s10273_s1 + $0x680] sm:$0xff]  }
  0x9a   : > { %7182 = vmatprep.subr.bf16.mxu1 %v7531_v54  ;;  %v7579_v54 = vld [vmem:[%s10273_s1 + $0x6c8] sm:$0xff]  }
  0x9b   : > { %7161 = vmatpush3.bf16.msra.mxu0 %v7530_v53  ;;  %v7578_v53 = vld [vmem:[%s10273_s1 + $0x608] sm:$0xff]  }
  0x9c   : > { %7162 = vmatprep.subr.bf16.mxu0 %v7533_v56  ;;  %v7581_v56 = vld [vmem:[%s10273_s1 + $0x650] sm:$0xff]  }
  0x9d   : > { %7183 = vmatpush3.bf16.msra.mxu1 %v7532_v55  ;;  %v7580_v55 = vld [vmem:[%s10273_s1 + $0x688] sm:$0xff]  }
  0x9e   : > { %7184 = vmatprep.subr.bf16.mxu1 %v7535_v58  ;;  %v7583_v58 = vld [vmem:[%s10273_s1 + $0x6d0] sm:$0xff]  }
  0x9f   : > { %7163 = vmatpush3.bf16.msra.mxu0 %v7534_v57  ;;  %v7582_v57 = vld [vmem:[%s10273_s1 + $0x610] sm:$0xff]  }
  0xa0   : > { %7164 = vmatprep.subr.bf16.mxu0 %v7537_v60  ;;  %v7585_v60 = vld [vmem:[%s10273_s1 + $0x658] sm:$0xff]  }
  0xa1   : > { %7185 = vmatpush3.bf16.msra.mxu1 %v7536_v59  ;;  %v7584_v59 = vld [vmem:[%s10273_s1 + $0x690] sm:$0xff]  }
  0xa2   : > { %7186 = vmatprep.subr.bf16.mxu1 %v7539_v62  ;;  %v7587_v62 = vld [vmem:[%s10273_s1 + $0x6d8] sm:$0xff]  }
  0xa3   : > { %7165 = vmatpush3.bf16.msra.mxu0 %v7538_v61  ;;  %v7586_v61 = vld [vmem:[%s10273_s1 + $0x618] sm:$0xff]  }
  0xa4   : > { %7194 = vmatprep.subr.bf16.mxu0 %v7541_v4  ;;  %v7593_v4 = vld [vmem:[%s10273_s1 + $0x668] sm:$0xff]  }
  0xa5   : > { %7187 = vmatpush3.bf16.msra.mxu1 %v7540_v1  ;;  %v7590_v1 = vld [vmem:[%s10273_s1 + $0x620] sm:$0xff]  }
  0xa6   : > { %3056 = vmatmul.mubr.bf16.vlgmr.msra.gmra.mrb[16].mxu0 %v280_v3  ;;  %7216 = vmatprep.subr.bf16.mxu1 %v7543_v10  ;;  %v7592_v3 = vld [vmem:[%s10273_s1 + $0x6a0] sm:$0xff]   ;;  %v7599_v10 = vld [vmem:[%s10273_s1 + $0x6f0] sm:$0xff]  }
  0xa7   : > { %7195 = vmatpush3.bf16.msra.mxu0 %v7542_v7  ;;  %3135 = vmatprep.mubr.bf16.mxu0 %v285_v40  ;;  %v7596_v7 = vld [vmem:[%s10273_s1 + $0x6a8] sm:$0xff]   ;;  %v7619_v40 = vld [vmem:[%s10273_s1 + $0x7d8] sm:$0xff]  }
  0xa8   : > { %3096 = vmatmul.mubr.bf16.vlgmr.msra.gmra.mrb[16].mxu1 %v282_v9  ;;  %7196 = vmatprep.subr.bf16.mxu0 %v7545_v12  ;;  %v7598_v9 = vld [vmem:[%s10273_s1 + $0x630] sm:$0xff]   ;;  %v7601_v12 = vld [vmem:[%s10273_s1 + $0x678] sm:$0xff]  }
  0xa9   : > { %7217 = vmatpush3.bf16.msra.mxu1 %v7544_v11  ;;  %3175 = vmatprep.mubr.bf16.mxu1 %v287_v46  ;;  %v7600_v11 = vld [vmem:[%s10273_s1 + $0x6b0] sm:$0xff]  }
  0xaa   : > { %7218 = vmatprep.subr.bf16.mxu1 %v7547_v14  ;;  %v7603_v14 = vld [vmem:[%s10273_s1 + $0x6f8] sm:$0xff]  }
  0xab   : > { %7197 = vmatpush3.bf16.msra.mxu0 %v7546_v13  ;;  %v7602_v13 = vld [vmem:[%s10273_s1 + $0x638] sm:$0xff]  }
  0xac   : > { %7198 = vmatprep.subr.bf16.mxu0 %v7549_v16 }
  0xad   : > { %7219 = vmatpush3.bf16.msra.mxu1 %v7548_v15  ;;  %v251_v15 = vld [vmem:[%s8282_s10 + $0xc8] sm:$0xff] }
  0xae   : > { %7220 = vmatprep.subr.bf16.mxu1 %v7551_v18  ;;  %v289_v16 = vpack.c.bf16 %v251_v15, %v251_v15  ;;  %v250_v18 = vld [vmem:[%s8282_s10 + $0xc0] sm:$0xff] }
  0xaf   : > { %7199 = vmatpush3.bf16.msra.mxu0 %v7550_v17  ;;  %v7604_v17 = vld [vmem:[%s10273_s1 + $0x6b8] sm:$0xff]   ;;  %v7639_v15 = vld [vmem:[%s10273_s1 + $0x8c0] sm:$0xff]  }
  0xb0   : > { %7200 = vmatprep.subr.bf16.mxu0 %v7553_v20  ;;  %v7605_v20 = vld [vmem:[%s10273_s1 + $0x740] sm:$0xff]  }
  0xb1   : > { %7221 = vmatpush3.bf16.msra.mxu1 %v7552_v19  ;;  %v288_v19 = vpack.c.bf16 %v250_v18, %v250_v18  ;;  %v7642_v18 = vld [vmem:[%s10273_s1 + $0x808] sm:$0xff]  }
  0xb2   : > { %7222 = vmatprep.subr.bf16.mxu1 %v7555_v22 }
  0xb3   : > { %7201 = vmatpush3.bf16.msra.mxu0 %v7554_v21  ;;  %v253_v21 = vld [vmem:[%s8282_s10 + $0xd8] sm:$0xff] }
  0xb4   : > { %7202 = vmatprep.subr.bf16.mxu0 %v7557_v24  ;;  %v291_v22 = vpack.c.bf16 %v253_v21, %v253_v21  ;;  %v252_v24 = vld [vmem:[%s8282_s10 + $0xd0] sm:$0xff] }
  0xb5   : > { %7223 = vmatpush3.bf16.msra.mxu1 %v7556_v23  ;;  %v7606_v23 = vld [vmem:[%s10273_s1 + $0x700] sm:$0xff]   ;;  %v7645_v21 = vld [vmem:[%s10273_s1 + $0x850] sm:$0xff]  }
  0xb6   : > { %7224 = vmatprep.subr.bf16.mxu1 %v7559_v26  ;;  %v7607_v26 = vld [vmem:[%s10273_s1 + $0x7c0] sm:$0xff]  }
  0xb7   : > { %7203 = vmatpush3.bf16.msra.mxu0 %v7558_v25  ;;  %v290_v25 = vpack.c.bf16 %v252_v24, %v252_v24  ;;  %v7648_v24 = vld [vmem:[%s10273_s1 + $0x890] sm:$0xff]  }
  0xb8   : > { %7204 = vmatprep.subr.bf16.mxu0 %v7561_v28  ;;  %v7609_v28 = vld [vmem:[%s10273_s1 + $0x748] sm:$0xff]  }
  0xb9   : > { %7225 = vmatpush3.bf16.msra.mxu1 %v7560_v27  ;;  %v7608_v27 = vld [vmem:[%s10273_s1 + $0x780] sm:$0xff]  }
  0xba   : > { %7226 = vmatprep.subr.bf16.mxu1 %v7563_v30  ;;  %v7611_v30 = vld [vmem:[%s10273_s1 + $0x7c8] sm:$0xff]  }
  0xbb   : > { %7205 = vmatpush3.bf16.msra.mxu0 %v7562_v29  ;;  %v7610_v29 = vld [vmem:[%s10273_s1 + $0x708] sm:$0xff]  }
  0xbc   : > { %7206 = vmatprep.subr.bf16.mxu0 %v7565_v32  ;;  %v7613_v32 = vld [vmem:[%s10273_s1 + $0x750] sm:$0xff]  }
  0xbd   : > { %7227 = vmatpush3.bf16.msra.mxu1 %v7564_v31  ;;  %v7612_v31 = vld [vmem:[%s10273_s1 + $0x788] sm:$0xff]  }
  0xbe   : > { %7228 = vmatprep.subr.bf16.mxu1 %v7567_v34  ;;  %v7615_v34 = vld [vmem:[%s10273_s1 + $0x7d0] sm:$0xff]  }
  0xbf   : > { %7207 = vmatpush3.bf16.msra.mxu0 %v7566_v33  ;;  %v7614_v33 = vld [vmem:[%s10273_s1 + $0x710] sm:$0xff]  }
  0xc0   : > { %7208 = vmatprep.subr.bf16.mxu0 %v7569_v36  ;;  %v7617_v36 = vld [vmem:[%s10273_s1 + $0x758] sm:$0xff]  }
  0xc1   : > { %7229 = vmatpush3.bf16.msra.mxu1 %v7568_v35  ;;  %v7616_v35 = vld [vmem:[%s10273_s1 + $0x790] sm:$0xff]  }
  0xc2   : > { %7230 = vmatprep.subr.bf16.mxu1 %v7571_v38  ;;  %v7618_v38 = vld [vmem:[%s10273_s1 + $0x718] sm:$0xff]  }
  0xc3   : > { %7209 = vmatpush3.bf16.msra.mxu0 %v7570_v37 }
  0xc4   : > { %7238 = vmatprep.subr.bf16.mxu0 %v7573_v44 }
  0xc5   : > { %7231 = vmatpush3.bf16.msra.mxu1 %v7572_v41 }
  0xc6   : > { %3136 = vmatmul.mubr.bf16.vlgmr.msra.gmra.mrb[20].mxu0 %v284_v43  ;;  %7260 = vmatprep.subr.bf16.mxu1 %v7575_v50  ;;  %v7620_v43 = vld [vmem:[%s10273_s1 + $0x798] sm:$0xff]  }
  0xc7   : > { %7239 = vmatpush3.bf16.msra.mxu0 %v7574_v47  ;;  %3215 = vmatprep.mubr.bf16.mxu0 %v289_v16  ;;  %v7622_v47 = vld [vmem:[%s10273_s1 + $0x720] sm:$0xff]  }
  0xc8   : > { %3176 = vmatmul.mubr.bf16.vlgmr.msra.gmra.mrb[20].mxu1 %v286_v49  ;;  %7240 = vmatprep.subr.bf16.mxu0 %v7577_v52  ;;  %v7623_v49 = vld [vmem:[%s10273_s1 + $0x7e0] sm:$0xff]  }
  0xc9   : > { %7261 = vmatpush3.bf16.msra.mxu1 %v7576_v51  ;;  %3255 = vmatprep.mubr.bf16.mxu1 %v291_v22  ;;  %v7624_v52 = vld [vmem:[%s10273_s1 + $0x7a0] sm:$0xff]   ;;  %v7646_v22 = vld [vmem:[%s10273_s1 + $0x810] sm:$0xff]  }
  0xca   : > { %7262 = vmatprep.subr.bf16.mxu1 %v7579_v54  ;;  %v7640_v16 = vld [vmem:[%s10273_s1 + $0x880] sm:$0xff]  }
  0xcb   : > { %7241 = vmatpush3.bf16.msra.mxu0 %v7578_v53  ;;  %v6368_v53 = vld [vmem:[%s10274_s2] ss:$0 sm:$0xff] }
  0xcc   : > { %7242 = vmatprep.subr.bf16.mxu0 %v7581_v56  ;;  %v7625_v56 = vld [vmem:[%s10273_s1 + $0x768] sm:$0xff]  }
  0xcd   : > { %7263 = vmatpush3.bf16.msra.mxu1 %v7580_v55 }
  0xce   : > { %7264 = vmatprep.subr.bf16.mxu1 %v7583_v58 }
  0xcf   : > { %7243 = vmatpush3.bf16.msra.mxu0 %v7582_v57  ;;  %v7626_v57 = vld [vmem:[%s10273_s1 + $0x728] sm:$0xff]  }
  0xd0   : > { %7244 = vmatprep.subr.bf16.mxu0 %v7585_v60  ;;  %v7628_v60 = vld [vmem:[%s10273_s1 + $0x7a8] sm:$0xff]  }
  0xd1   : > { %7265 = vmatpush3.bf16.msra.mxu1 %v7584_v59  ;;  %v7627_v59 = vld [vmem:[%s10273_s1 + $0x7e8] sm:$0xff]  }
  0xd2   : > { %7266 = vmatprep.subr.bf16.mxu1 %v7587_v62  ;;  %v7630_v62 = vld [vmem:[%s10273_s1 + $0x730] sm:$0xff]  }
  0xd3   : > { %7245 = vmatpush3.bf16.msra.mxu0 %v7586_v61  ;;  %v7629_v61 = vld [vmem:[%s10273_s1 + $0x770] sm:$0xff]  }
  0xd4   : > { %7246 = vmatprep.subr.bf16.mxu0 %v7589_v0  ;;  %v7632_v0 = vld [vmem:[%s10273_s1 + $0x7b0] sm:$0xff]  }
  0xd5   : > { %7267 = vmatpush3.bf16.msra.mxu1 %v7588_v63  ;;  %v7631_v63 = vld [vmem:[%s10273_s1 + $0x7f0] sm:$0xff]  }
  0xd6   : > { %7268 = vmatprep.subr.bf16.mxu1 %v7591_v2  ;;  %v7634_v2 = vld [vmem:[%s10273_s1 + $0x738] sm:$0xff]  }
  0xd7   : > { %7247 = vmatpush3.bf16.msra.mxu0 %v7590_v1  ;;  %v7633_v1 = vld [vmem:[%s10273_s1 + $0x778] sm:$0xff]  }
  0xd8   : > { %7248 = vmatprep.subr.bf16.mxu0 %v7593_v4  ;;  %v255_v4 = vld [vmem:[%s8282_s10 + $0xe8] sm:$0xff] }
  0xd9   : > { %7269 = vmatpush3.bf16.msra.mxu1 %v7592_v3  ;;  %v7635_v3 = vld [vmem:[%s10273_s1 + $0x7f8] sm:$0xff]  }
  0xda   : > { %7270 = vmatprep.subr.bf16.mxu1 %v7595_v6  ;;  %v7636_v6 = vld [vmem:[%s10273_s1 + $0x7b8] sm:$0xff]  }
  0xdb   : > { %7249 = vmatpush3.bf16.msra.mxu0 %v7594_v5  ;;  %v293_v5 = vpack.c.bf16 %v255_v4, %v255_v4  ;;  %v7671_v4 = vld [vmem:[%s10273_s1 + $0x910] sm:$0xff]  }
  0xdc   : > { %7250 = vmatprep.subr.bf16.mxu0 %v7597_v8 }
  0xdd   : > { %7271 = vmatpush3.bf16.msra.mxu1 %v7596_v7  ;;  %v254_v7 = vld [vmem:[%s8282_s10 + $0xe0] sm:$0xff] }
  0xde   : > { %7272 = vmatprep.subr.bf16.mxu1 %v7599_v10  ;;  %v292_v8 = vpack.c.bf16 %v254_v7, %v254_v7  ;;  %v257_v10 = vld [vmem:[%s8282_s10 + $0xf8] sm:$0xff] }
  0xdf   : > { %7251 = vmatpush3.bf16.msra.mxu0 %v7598_v9  ;;  %v7637_v9 = vld [vmem:[%s10273_s1 + $0x840] sm:$0xff]  }
  0xe0   : > { %7252 = vmatprep.subr.bf16.mxu0 %v7601_v12  ;;  %v7638_v12 = vld [vmem:[%s10273_s1 + $0x800] sm:$0xff]  }
  0xe1   : > { %7273 = vmatpush3.bf16.msra.mxu1 %v7600_v11  ;;  %v295_v11 = vpack.c.bf16 %v257_v10, %v257_v10 }
  0xe2   : > { %7274 = vmatprep.subr.bf16.mxu1 %v7603_v14 }
  0xe3   : > { %7253 = vmatpush3.bf16.msra.mxu0 %v7602_v13  ;;  %v256_v13 = vld [vmem:[%s8282_s10 + $0xf0] sm:$0xff] }
  0xe4   : > { %7282 = vmatprep.subr.bf16.mxu0 %v7605_v20  ;;  %v294_v14 = vpack.c.bf16 %v256_v13, %v256_v13  ;;  %v7644_v20 = vld [vmem:[%s10273_s1 + $0x888] sm:$0xff]  }
  0xe5   : > { %7275 = vmatpush3.bf16.msra.mxu1 %v7604_v17  ;;  %v7641_v17 = vld [vmem:[%s10273_s1 + $0x848] sm:$0xff]  }
  0xe6   : > { %3216 = vmatmul.mubr.bf16.vlgmr.msra.gmra.mrb[24].mxu0 %v288_v19  ;;  %7304 = vmatprep.subr.bf16.mxu1 %v7607_v26  ;;  %v7643_v19 = vld [vmem:[%s10273_s1 + $0x8c8] sm:$0xff]  }
  0xe7   : > { %7283 = vmatpush3.bf16.msra.mxu0 %v7606_v23  ;;  %3295 = vmatprep.mubr.bf16.mxu0 %v293_v5  ;;  %v7647_v23 = vld [vmem:[%s10273_s1 + $0x8d0] sm:$0xff]   ;;  %v7672_v5 = vld [vmem:[%s10273_s1 + $0x918] sm:$0xff]  }
  0xe8   : > { %3256 = vmatmul.mubr.bf16.vlgmr.msra.gmra.mrb[24].mxu1 %v290_v25  ;;  %7284 = vmatprep.subr.bf16.mxu0 %v7609_v28  ;;  %v7649_v25 = vld [vmem:[%s10273_s1 + $0x858] sm:$0xff]  }
  0xe9   : > { %7305 = vmatpush3.bf16.msra.mxu1 %v7608_v27  ;;  %3335 = vmatprep.mubr.bf16.mxu1 %v295_v11  ;;  %v7650_v27 = vld [vmem:[%s10273_s1 + $0x818] sm:$0xff]  }
  0xea   : > { %7306 = vmatprep.subr.bf16.mxu1 %v7611_v30 }
  0xeb   : > { %7285 = vmatpush3.bf16.msra.mxu0 %v7610_v29  ;;  %v7651_v29 = vld [vmem:[%s10273_s1 + $0x8d8] sm:$0xff]  }
  0xec   : > { %7286 = vmatprep.subr.bf16.mxu0 %v7613_v32  ;;  %v7652_v32 = vld [vmem:[%s10273_s1 + $0x898] sm:$0xff]  }
  0xed   : > { %7307 = vmatpush3.bf16.msra.mxu1 %v7612_v31 }
  0xee   : > { %7308 = vmatprep.subr.bf16.mxu1 %v7615_v34  ;;  %v7653_v34 = vld [vmem:[%s10273_s1 + $0x860] sm:$0xff]  }
  0xef   : > { %7287 = vmatpush3.bf16.msra.mxu0 %v7614_v33 }
  0xf0   : > { %7288 = vmatprep.subr.bf16.mxu0 %v7617_v36 }
  0xf1   : > { %7309 = vmatpush3.bf16.msra.mxu1 %v7616_v35 }
  0xf2   : > { %7310 = vmatprep.subr.bf16.mxu1 %v7619_v40 }
  0xf3   : > { %7289 = vmatpush3.bf16.msra.mxu0 %v7618_v38 }
  0xf4   : > { %7290 = vmatprep.subr.bf16.mxu0 %v7621_v45 }
  0xf5   : > { %7311 = vmatpush3.bf16.msra.mxu1 %v7620_v43 }
  0xf6   : > { %7312 = vmatprep.subr.bf16.mxu1 %v7623_v49  ;;  %v7661_v49 = vld [vmem:[%s10273_s1 + $0x870] sm:$0xff]  }
  0xf7   : > { %7291 = vmatpush3.bf16.msra.mxu0 %v7622_v47  ;;  %v7659_v47 = vld [vmem:[%s10273_s1 + $0x8e8] sm:$0xff]  }
  0xf8   : > { %7292 = vmatprep.subr.bf16.mxu0 %v7625_v56  ;;  %v259_v56 = vld [vmem:[%s8282_s10 + $0x108] sm:$0xff] }
  0xf9   : > { %v6990_v37 = vpop.f32.mrb[0].mxu0  ;;  %7313 = vmatpush3.bf16.msra.mxu1 %v7624_v52  ;;  %v7664_v52 = vld [vmem:[%s10273_s1 + $0x8b0] sm:$0xff]  }
  0xfa   : > { %v6991_v39 = vpop.f32.mrb[1].mxu0  ;;  %7314 = vmatprep.subr.bf16.mxu1 %v7627_v59  ;;  %v258_v59 = vld [vmem:[%s8282_s10 + $0x100] sm:$0xff] }
  0xfb   : > { %v6992_v41 = vadd.f32 %v6991_v39, %v6990_v37  ;;  %v6993_v42 = vpop.f32.mrb[2].mxu0  ;;  %v7012_v44 = vpop.f32.mrb[0].mxu1  ;;  %7293 = vmatpush3.bf16.msra.mxu0 %v7626_v57  ;;  %v7654_v37 = vld [vmem:[%s10273_s1 + $0x820] sm:$0xff]   ;;  %v297_v57 = vpack.c.bf16 %v259_v56, %v259_v56 }
  0xfc   : > { %v6994_v46 = vpop.f32.mrb[3].mxu0  ;;  %v7013_v48 = vpop.f32.mrb[1].mxu1  ;;  %7294 = vmatprep.subr.bf16.mxu0 %v7629_v61  ;;  %v7655_v39 = vld [vmem:[%s10273_s1 + $0x8e0] sm:$0xff]   ;;  %v261_v61 = vld [vmem:[%s8282_s10 + $0x118] sm:$0xff] }
  0xfd   : > { %v7014_v50 = vadd.f32 %v7013_v48, %v7012_v44  ;;  %v7015_v51 = vpop.f32.mrb[2].mxu1  ;;  %v2738_v55 = vadd.f32 %v6992_v41, %v6368_v53  ;;  %7315 = vmatpush3.bf16.msra.mxu1 %v7628_v60  ;;  %v7656_v42 = vld [vmem:[%s10273_s1 + $0x8a0] sm:$0xff]   ;;  %v7657_v44 = vld [vmem:[%s10273_s1 + $0x868] sm:$0xff]   ;;  %v7665_v53 = vld [vmem:[%s10273_s1 + $0x878] sm:$0xff]   ;;  %v8143_v60 = vmov 0  }
  0xfe   : > { %v7016_v54 = vpop.f32.mrb[3].mxu1  ;;  %7316 = vmatprep.subr.bf16.mxu1 %v7631_v63  ;;  %v7658_v46 = vld [vmem:[%s10273_s1 + $0x828] sm:$0xff]   ;;  %v7663_v51 = vld [vmem:[%s10273_s1 + $0x8f0] sm:$0xff]   ;;  %v299_v63 = vpack.c.bf16 %v261_v61, %v261_v61  ;;  %v7679_v56 = vld [vmem:[%s10275_s3] ss:$152 sps:$4 sm:$0xff]  }
  0xff   : > { %v8966_v58 = vadd.f32 %v7014_v50, %v2738_v55  ;;  %7295 = vmatpush3.bf16.msra.mxu0 %v7630_v62  ;;  %v7660_v48 = vld [vmem:[%s10273_s1 + $0x8a8] sm:$0xff]   ;;  %v7662_v50 = vld [vmem:[%s10273_s1 + $0x830] sm:$0xff]   ;;  %v7666_v54 = vld [vmem:[%s10273_s1 + $0x838] sm:$0xff]   ;;  %v296_v62 = vpack.c.bf16 %v258_v59, %v258_v59 }
 0x100   : > { %7296 = vmatprep.subr.bf16.mxu0 %v7633_v1  ;;  %v7667_v55 = vld [vmem:[%s10273_s1 + $0x8f8] sm:$0xff]   ;;  %v260_v1 = vld [vmem:[%s8282_s10 + $0x110] sm:$0xff] }
 0x101   : > { %7317 = vmatpush3.bf16.msra.mxu1 %v7632_v0  ;;  %v7669_v0 = vld [vmem:[%s10273_s1 + $0x900] sm:$0xff]   ;;  %v7684_v59 = vld [vmem:[%s10275_s3 + $0x14] ss:$152 sps:$4 sm:$0xff]  }
 0x102   : > { %7318 = vmatprep.subr.bf16.mxu1 %v7635_v3  ;;  %v7670_v3 = vld [vmem:[%s10273_s1 + $0x908] sm:$0xff]  }
 0x103   : > { %7297 = vmatpush3.bf16.msra.mxu0 %v7634_v2  ;;  %v298_v2 = vpack.c.bf16 %v260_v1, %v260_v1  ;;  %v7687_v61 = vld [vmem:[%s10275_s3 + $0x134] ss:$152 sps:$4 sm:$0xff]   ;;  %v7693_v1 = vld [vmem:[%s10275_s3 + $0x264] ss:$152 sps:$4 sm:$0xff]  }
 0x104   : > { %7326 = vmatprep.subr.bf16.mxu0 %v7637_v9 }
 0x105   : > { %7319 = vmatpush3.bf16.msra.mxu1 %v7636_v6  ;;  %v263_v6 = vld [vmem:[%s8282_s10 + $0x128] sm:$0xff] }
 0x106   : > { %3296 = vmatmul.mubr.bf16.vlgmr.msra.gmra.mrb[28].mxu0 %v292_v8  ;;  %7348 = vmatprep.subr.bf16.mxu1 %v7639_v15  ;;  %v301_v7 = vpack.c.bf16 %v263_v6, %v263_v6  ;;  %v7673_v8 = vld [vmem:[%s10273_s1 + $0x920] sm:$0xff]   ;;  %v7697_v6 = vld [vmem:[%s10275_s3 + $0x390] ss:$152 sps:$4 sm:$0xff]  }
 0x107   : > { %7327 = vmatpush3.bf16.msra.mxu0 %v7638_v12  ;;  %3375 = vmatprep.mubr.bf16.mxu0 %v297_v57  ;;  %v7681_v57 = vld [vmem:[%s10275_s3 + $0x4] ss:$152 sps:$4 sm:$0xff]  }
 0x108   : > { %3336 = vmatmul.mubr.bf16.vlgmr.msra.gmra.mrb[28].mxu1 %v294_v14  ;;  %7328 = vmatprep.subr.bf16.mxu0 %v7641_v17  ;;  %v7674_v17 = vld [vmem:[%s10273_s1 + $0x928] sm:$0xff]  }
 0x109   : > { %7349 = vmatpush3.bf16.msra.mxu1 %v7640_v16  ;;  %3415 = vmatprep.mubr.bf16.mxu1 %v299_v63  ;;  %v7685_v63 = vld [vmem:[%s10275_s3 + $0x130] ss:$152 sps:$4 sm:$0xff]  }
 0x10a   : > { %7350 = vmatprep.subr.bf16.mxu1 %v7643_v19 }
 0x10b   : > { %7329 = vmatpush3.bf16.msra.mxu0 %v7642_v18 }
 0x10c   : > { %7330 = vmatprep.subr.bf16.mxu0 %v7645_v21 }
 0x10d   : > { %7351 = vmatpush3.bf16.msra.mxu1 %v7644_v20 }
 0x10e   : > { %7352 = vmatprep.subr.bf16.mxu1 %v7647_v23  ;;  %v7676_v23 = vld [vmem:[%s10273_s1 + $0x938] sm:$0xff]  }
 0x10f   : > { %7331 = vmatpush3.bf16.msra.mxu0 %v7646_v22  ;;  %v7675_v22 = vld [vmem:[%s10273_s1 + $0x930] sm:$0xff]  }
 0x110   : > { %7332 = vmatprep.subr.bf16.mxu0 %v7649_v25  ;;  %v7678_v25 = vld [vmem:[%s10273_s1 + $0x948] sm:$0x1f]  }
 0x111   : > { %7353 = vmatpush3.bf16.msra.mxu1 %v7648_v24  ;;  %v7677_v24 = vld [vmem:[%s10273_s1 + $0x940] sm:$0xff]  }
 0x112   : > { %7354 = vmatprep.subr.bf16.mxu1 %v7651_v29  ;;  %v262_v29 = vld [vmem:[%s8282_s10 + $0x120] sm:$0xff] }
 0x113   : > { %7333 = vmatpush3.bf16.msra.mxu0 %v7650_v27 }
 0x114   : > { %7334 = vmatprep.subr.bf16.mxu0 %v7653_v34 }
 0x115   : > { %7355 = vmatpush3.bf16.msra.mxu1 %v7652_v32 }
 0x116   : > { %7356 = vmatprep.subr.bf16.mxu1 %v7655_v39 }
 0x117   : > { %7335 = vmatpush3.bf16.msra.mxu0 %v7654_v37 }
 0x118   : > { %7336 = vmatprep.subr.bf16.mxu0 %v7657_v44 }
 0x119   : > { %v7034_v26 = vpop.f32.mrb[4].mxu0  ;;  %7357 = vmatpush3.bf16.msra.mxu1 %v7656_v42 }
 0x11a   : > { %v7035_v28 = vpop.f32.mrb[5].mxu0  ;;  %7358 = vmatprep.subr.bf16.mxu1 %v7659_v47 }
 0x11b   : > { %v7036_v30 = vadd.f32 %v7035_v28, %v7034_v26  ;;  %v7037_v31 = vpop.f32.mrb[6].mxu0  ;;  %v7056_v33 = vpop.f32.mrb[4].mxu1  ;;  %7337 = vmatpush3.bf16.msra.mxu0 %v7658_v46  ;;  %v8144_v26 = vmov 65535  }
 0x11c   : > { %v7038_v36 = vpop.f32.mrb[7].mxu0  ;;  %v7057_v38 = vpop.f32.mrb[5].mxu1  ;;  %7338 = vmatprep.subr.bf16.mxu0 %v7661_v49  ;;  %v2698_v27 = vsel %vm2696_vm1, 4294967295, %v8144_v26  ;;  %v300_v31 = vpack.c.bf16 %v262_v29, %v262_v29 }
 0x11d   : > { %v2818_v35 = vadd.f32 %v7036_v30, %v8966_v58  ;;  %v7058_v40 = vadd.f32 %v7057_v38, %v7056_v33  ;;  %v7059_v41 = vpop.f32.mrb[6].mxu1  ;;  %7359 = vmatpush3.bf16.msra.mxu1 %v7660_v48  ;;  %v7668_v58 = vld [vmem:[%s10273_s1 + $0x8b8] sm:$0xff]   ;;  %v2699_v28 = vsel %vm2697_vm2, %v2698_v27, 0 }
 0x11e   : > { %v7060_v43 = vpop.f32.mrb[7].mxu1  ;;  %7360 = vmatprep.subr.bf16.mxu1 %v7663_v51  ;;  %v2701_v30 = vand.u32 %v7678_v25, %v2699_v28 }
 0x11f   : > { %v9066_v45 = vadd.f32 %v7058_v40, %v2818_v35  ;;  %7339 = vmatpush3.bf16.msra.mxu0 %v7662_v50 }
 0x120   : > { %7340 = vmatprep.subr.bf16.mxu0 %v7665_v53 }
 0x121   : > { %7361 = vmatpush3.bf16.msra.mxu1 %v7664_v52 }
 0x122   : > { %7362 = vmatprep.subr.bf16.mxu1 %v7667_v55 }
 0x123   : > { %7341 = vmatpush3.bf16.msra.mxu0 %v7666_v54 }
 0x124   : > { %3423 = vmatprep.subr.bf16.mxu0 %v8143_v60 }
 0x125   : > { %7363 = vmatpush3.bf16.msra.mxu1 %v7668_v58  ;;  %v7682_v58 = vld [vmem:[%s10275_s3 + $0x10] ss:$152 sps:$4 sm:$0xff]  }
 0x126   : > { %3376 = vmatmul.mubr.bf16.vlgmr.msra.gmra.mrb[32].mxu0 %v296_v62  ;;  %5489 = vmatprep.subr.bf16.mxu1 %v7681_v57  ;;  %v7690_v62 = vld [vmem:[%s10275_s3 + $0x144] ss:$152 sps:$4 sm:$0xff]  }
 0x127   : > { %3424 = vmatpush1.bf16.msra.mxu0 %v7669_v0  ;;  %6667 = vmatprep.mubr.msk.bf16.mxu0 %vm2692_vm0, %v301_v7  ;;  %v7688_v0 = vld [vmem:[%s10275_s3 + $0x140] ss:$152 sps:$4 sm:$0xff]   ;;  %v7702_v7 = vld [vmem:[%s10275_s3 + $0x3a4] ss:$152 sps:$4 sm:$0xff]  }
 0x128   : > { %3416 = vmatmul.mubr.bf16.vlgmr.msra.gmra.mrb[32].mxu1 %v298_v2  ;;  %3425 = vmatprep.subr.bf16.mxu0 %v8143_v60  ;;  %v7696_v2 = vld [vmem:[%s10275_s3 + $0x274] ss:$152 sps:$4 sm:$0xff]  }
 0x129   : > { %5521 = vmatprep.mubr.bf16.mxu1 %v8143_v60  ;;  %5490 = vmatpush1.bf16.msra.mxu1 %v7679_v56 }
 0x12a   : > { %5491 = vmatprep.subr.bf16.mxu1 %v7687_v61 }
 0x12b   : > { %3426 = vmatpush1.bf16.msra.mxu0 %v7670_v3  ;;  %v7691_v3 = vld [vmem:[%s10275_s3 + $0x260] ss:$152 sps:$4 sm:$0xff]  }
 0x12c   : > { %3427 = vmatprep.subr.bf16.mxu0 %v8143_v60 }
 0x12d   : > { %5492 = vmatpush1.bf16.msra.mxu1 %v7685_v63 }
 0x12e   : > { %5493 = vmatprep.subr.bf16.mxu1 %v7693_v1 }
 0x12f   : > { %3428 = vmatpush1.bf16.msra.mxu0 %v7671_v4  ;;  %v7694_v4 = vld [vmem:[%s10275_s3 + $0x270] ss:$152 sps:$4 sm:$0xff]  }
 0x130   : > { %3429 = vmatprep.subr.bf16.mxu0 %v8143_v60 }
 0x131   : > { %5494 = vmatpush1.bf16.msra.mxu1 %v7691_v3 }
 0x133   : > { %3430 = vmatpush1.bf16.msra.mxu0 %v7672_v5  ;;  %v7699_v5 = vld [vmem:[%s10275_s3 + $0x394] ss:$152 sps:$4 sm:$0xff]  }
 0x134   : > { %3431 = vmatprep.subr.bf16.mxu0 %v8143_v60  ;;  %5495 = vmatprep.subr.bf16.mxu1 %v7699_v5 }
 0x135   : > { %5496 = vmatpush1.bf16.msra.mxu1 %v7697_v6 }
 0x137   : > { %3432 = vmatpush1.bf16.msra.mxu0 %v7673_v8  ;;  %v7700_v8 = vld [vmem:[%s10275_s3 + $0x3a0] ss:$152 sps:$4 sm:$0xff]  }
 0x138   : > { %3433 = vmatprep.subr.bf16.mxu0 %v8143_v60 }
 0x139   : > { %v7078_v9 = vpop.f32.mrb[8].mxu0 }
 0x13a   : > { %v7079_v10 = vpop.f32.mrb[9].mxu0 }
 0x13b   : > { %v7080_v11 = vadd.f32 %v7079_v10, %v7078_v9  ;;  %v7081_v12 = vpop.f32.mrb[10].mxu0  ;;  %v7100_v13 = vpop.f32.mrb[8].mxu1  ;;  %3434 = vmatpush1.bf16.msra.mxu0 %v7674_v17  ;;  %v7705_v9 = vld [vmem:[%s10275_s3 + $0x4c4] ss:$152 sps:$4 sm:$0xff]   ;;  %v7708_v10 = vld [vmem:[%s10275_s3 + $0x4d4] ss:$152 sps:$4 sm:$0xff]  }
 0x13c   : > { %v7082_v14 = vpop.f32.mrb[11].mxu0  ;;  %v7101_v15 = vpop.f32.mrb[9].mxu1  ;;  %3435 = vmatprep.subr.bf16.mxu0 %v8143_v60  ;;  %v7706_v12 = vld [vmem:[%s10275_s3 + $0x4d0] ss:$152 sps:$4 sm:$0xff]   ;;  %5497 = vmatprep.subr.bf16.mxu1 %v7705_v9  ;;  %v7717_v17 = vld [vmem:[%s10275_s3 + $0x724] ss:$152 sps:$4 sm:$0xff]  }
 0x13d   : > { %v2898_v16 = vadd.f32 %v7080_v11, %v9066_v45  ;;  %v7102_v18 = vadd.f32 %v7101_v15, %v7100_v13  ;;  %v7103_v19 = vpop.f32.mrb[10].mxu1  ;;  %v7703_v11 = vld [vmem:[%s10275_s3 + $0x4c0] ss:$152 sps:$4 sm:$0xff]   ;;  %v7711_v13 = vld [vmem:[%s10275_s3 + $0x5f4] ss:$152 sps:$4 sm:$0xff]  }
 0x13e   : > { %v7104_v20 = vpop.f32.mrb[11].mxu1  ;;  %v7714_v14 = vld [vmem:[%s10275_s3 + $0x604] ss:$152 sps:$4 sm:$0xff]   ;;  %v7709_v15 = vld [vmem:[%s10275_s3 + $0x5f0] ss:$152 sps:$4 sm:$0xff]   ;;  %5498 = vmatpush1.bf16.msra.mxu1 %v7703_v11 }
 0x13f   : > { %v2938_v21 = vadd.f32 %v7102_v18, %v2898_v16  ;;  %3436 = vmatpush1.bf16.msra.mxu0 %v7675_v22  ;;  %v7712_v16 = vld [vmem:[%s10275_s3 + $0x600] ss:$152 sps:$4 sm:$0xff]   ;;  %v7720_v18 = vld [vmem:[%s10275_s3 + $0x734] ss:$152 sps:$4 sm:$0xff]   ;;  %5499 = vmatprep.subr.bf16.mxu1 %v7711_v13  ;;  %v7718_v20 = vld [vmem:[%s10275_s3 + $0x730] ss:$152 sps:$4 sm:$0xff]  }
 0x140   : > { %3437 = vmatprep.subr.bf16.mxu0 %v8143_v60  ;;  %v7715_v19 = vld [vmem:[%s10275_s3 + $0x720] ss:$152 sps:$4 sm:$0xff]  }
 0x142   : > { %5500 = vmatpush1.bf16.msra.mxu1 %v7709_v15 }
 0x143   : > { %3438 = vmatpush1.bf16.msra.mxu0 %v7676_v23  ;;  %5501 = vmatprep.subr.bf16.mxu1 %v7717_v17 }
 0x144   : > { %3439 = vmatprep.subr.bf16.mxu0 %v8143_v60 }
 0x146   : > { %5502 = vmatpush1.bf16.msra.mxu1 %v7715_v19  ;;  %v7730_v19 = vld [vmem:[%s10275_s3 + $0x20] ss:$152 sps:$4 sm:$0xff]  }
 0x147   : > { %3440 = vmatpush1.bf16.msra.mxu0 %v7677_v24 }
 0x148   : > { %3441 = vmatprep.subr.bf16.mxu0 %v8143_v60 }
 0x14b   : > { %3442 = vmatpush1.bf16.msra.mxu0 %v2701_v30 }
 0x14c   : > { %5571 = vmatprep.subr.bf16.mxu0 %v7684_v59 }
 0x14e   : > { %3456 = vmatmul.mubr.bf16.vlgmr.msra.gmra.mrb[36].mxu0 %v300_v31 }
 0x14f   : > { %5603 = vmatprep.mubr.bf16.mxu0 %v8143_v60  ;;  %5572 = vmatpush1.bf16.msra.mxu0 %v7682_v58 }
 0x150   : > { %5573 = vmatprep.subr.bf16.mxu0 %v7690_v62 }
 0x153   : > { %5574 = vmatpush1.bf16.msra.mxu0 %v7688_v0 }
 0x154   : > { %5575 = vmatprep.subr.bf16.mxu0 %v7696_v2 }
 0x157   : > { %5576 = vmatpush1.bf16.msra.mxu0 %v7694_v4 }
 0x158   : > { %5577 = vmatprep.subr.bf16.mxu0 %v7702_v7 }
 0x159   : > { %v7122_v32 = vpop.f32.mrb[12].mxu0 }
 0x15a   : > { %v7123_v33 = vpop.f32.mrb[13].mxu0 }
 0x15b   : > { %v7124_v34 = vadd.f32 %v7123_v33, %v7122_v32  ;;  %v7125_v35 = vpop.f32.mrb[14].mxu0  ;;  %v7144_v36 = vpop.f32.mrb[12].mxu1  ;;  %5578 = vmatpush1.bf16.msra.mxu0 %v7700_v8  ;;  %v7723_v33 = vld [vmem:[%s10275_s3 + $0x854] ss:$152 sps:$4 sm:$0xff]  }
 0x15c   : > { %v7126_v37 = vpop.f32.mrb[15].mxu0  ;;  %v7145_v39 = vpop.f32.mrb[13].mxu1  ;;  %5579 = vmatprep.subr.bf16.mxu0 %v7708_v10  ;;  %v7721_v35 = vld [vmem:[%s10275_s3 + $0x850] ss:$152 sps:$4 sm:$0xff]   ;;  %5503 = vmatprep.subr.bf16.mxu1 %v7723_v33  ;;  %v7753_v33 = vld [vmem:[%s10275_s3 + $0x4cc] ss:$152 sps:$4 sm:$0xff]  }
 0x15d   : > { %v2978_v38 = vadd.f32 %v7124_v34, %v2938_v21  ;;  %v7146_v40 = vadd.f32 %v7145_v39, %v7144_v36  ;;  %v7147_v41 = vpop.f32.mrb[14].mxu1  ;;  %v7726_v34 = vld [vmem:[%s10275_s3 + $0x864] ss:$152 sps:$4 sm:$0xff]   ;;  %v7724_v36 = vld [vmem:[%s10275_s3 + $0x860] ss:$152 sps:$4 sm:$0xff]   ;;  %5504 = vmatpush1.bf16.msra.mxu1 %v7721_v35 }
 0x15e   : > { %v7148_v42 = vpop.f32.mrb[15].mxu1  ;;  %v7729_v37 = vld [vmem:[%s10275_s3 + $0xc] ss:$152 sps:$4 sm:$0xff]   ;;  %v7751_v35 = vld [vmem:[%s10275_s3 + $0x4c8] ss:$152 sps:$4 sm:$0xff]  }
 0x15f   : > { %v3018_v43 = vadd.f32 %v7146_v40, %v2978_v38  ;;  %5580 = vmatpush1.bf16.msra.mxu0 %v7706_v12  ;;  %v7732_v38 = vld [vmem:[%s10275_s3 + $0x24] ss:$152 sps:$4 sm:$0xff]   ;;  %5530 = vmatprep.subr.bf16.mxu1 %v7729_v37 }
 0x160   : > { %5581 = vmatprep.subr.bf16.mxu0 %v7714_v14  ;;  %v7759_v37 = vld [vmem:[%s10275_s3 + $0x5fc] ss:$152 sps:$4 sm:$0xff]  }
 0x163   : > { %5582 = vmatpush1.bf16.msra.mxu0 %v7712_v16 }
 0x164   : > { %5583 = vmatprep.subr.bf16.mxu0 %v7720_v18  ;;  %v7727_v18 = vld [vmem:[%s10275_s3 + $0x8] ss:$152 sps:$4 sm:$0xff]  }
 0x167   : > { %5584 = vmatpush1.bf16.msra.mxu0 %v7718_v20 }
 0x168   : > { %5585 = vmatprep.subr.bf16.mxu0 %v7726_v34  ;;  %v7756_v34 = vld [vmem:[%s10275_s3 + $0x4e4] ss:$152 sps:$4 sm:$0xff]  }
 0x16b   : > { %5586 = vmatpush1.bf16.msra.mxu0 %v7724_v36  ;;  %v7754_v36 = vld [vmem:[%s10275_s3 + $0x4e0] ss:$152 sps:$4 sm:$0xff]  }
 0x16c   : > { %5653 = vmatprep.subr.bf16.mxu0 %v7732_v38  ;;  %v7762_v38 = vld [vmem:[%s10275_s3 + $0x614] ss:$152 sps:$4 sm:$0xff]  }
 0x179   : > { %v7166_v44 = vpop.f32.mrb[16].mxu0 }
 0x17a   : > { %v7167_v45 = vpop.f32.mrb[17].mxu0 }
 0x17b   : > { %v7168_v46 = vadd.f32 %v7167_v45, %v7166_v44  ;;  %v7169_v47 = vpop.f32.mrb[18].mxu0  ;;  %v7188_v48 = vpop.f32.mrb[16].mxu1 }
 0x17c   : > { %v7170_v49 = vpop.f32.mrb[19].mxu0  ;;  %v7189_v51 = vpop.f32.mrb[17].mxu1 }
 0x17d   : > { %v3058_v50 = vadd.f32 %v7168_v46, %v3018_v43  ;;  %v7190_v52 = vadd.f32 %v7189_v51, %v7188_v48  ;;  %v7191_v53 = vpop.f32.mrb[18].mxu1 }
 0x17e   : > { %v7192_v54 = vpop.f32.mrb[19].mxu1 }
 0x17f   : > { %v9151_v55 = vadd.f32 %v7190_v52, %v3058_v50 }
 0x199   : > { %v7210_v21 = vpop.f32.mrb[20].mxu0 }
 0x19a   : > { %v7211_v22 = vpop.f32.mrb[21].mxu0 }
 0x19b   : > { %v7212_v23 = vadd.f32 %v7211_v22, %v7210_v21  ;;  %v7213_v24 = vpop.f32.mrb[22].mxu0  ;;  %v7232_v25 = vpop.f32.mrb[20].mxu1  ;;  %v7735_v21 = vld [vmem:[%s10275_s3 + $0x13c] ss:$152 sps:$4 sm:$0xff]  }
 0x19c   : > { %v7214_v26 = vpop.f32.mrb[23].mxu0  ;;  %v7233_v27 = vpop.f32.mrb[21].mxu1  ;;  %v7738_v22 = vld [vmem:[%s10275_s3 + $0x154] ss:$152 sps:$4 sm:$0xff]   ;;  %v7736_v24 = vld [vmem:[%s10275_s3 + $0x150] ss:$152 sps:$4 sm:$0xff]  }
 0x19d   : > { %v3138_v28 = vadd.f32 %v7212_v23, %v9151_v55  ;;  %v7234_v29 = vadd.f32 %v7233_v27, %v7232_v25  ;;  %v7235_v30 = vpop.f32.mrb[22].mxu1  ;;  %v7733_v23 = vld [vmem:[%s10275_s3 + $0x138] ss:$152 sps:$4 sm:$0xff]   ;;  %v7741_v25 = vld [vmem:[%s10275_s3 + $0x26c] ss:$152 sps:$4 sm:$0xff]  }
 0x19e   : > { %v7236_v31 = vpop.f32.mrb[23].mxu1  ;;  %v7744_v26 = vld [vmem:[%s10275_s3 + $0x284] ss:$152 sps:$4 sm:$0xff]   ;;  %v7739_v27 = vld [vmem:[%s10275_s3 + $0x268] ss:$152 sps:$4 sm:$0xff]  }
 0x19f   : > { %v3178_v32 = vadd.f32 %v7234_v29, %v3138_v28  ;;  %v7742_v28 = vld [vmem:[%s10275_s3 + $0x280] ss:$152 sps:$4 sm:$0xff]   ;;  %v7747_v29 = vld [vmem:[%s10275_s3 + $0x39c] ss:$152 sps:$4 sm:$0xff]  }
 0x1a0   : > { %v7750_v30 = vld [vmem:[%s10275_s3 + $0x3b4] ss:$152 sps:$4 sm:$0xff]   ;;  %v7745_v31 = vld [vmem:[%s10275_s3 + $0x398] ss:$152 sps:$4 sm:$0xff]  }
 0x1b9   : > { %v7254_v39 = vpop.f32.mrb[24].mxu0 }
 0x1ba   : > { %v7255_v40 = vpop.f32.mrb[25].mxu0 }
 0x1bb   : > { %v7256_v41 = vadd.f32 %v7255_v40, %v7254_v39  ;;  %v7257_v42 = vpop.f32.mrb[26].mxu0  ;;  %v7276_v43 = vpop.f32.mrb[24].mxu1  ;;  %v7757_v39 = vld [vmem:[%s10275_s3 + $0x5f8] ss:$152 sps:$4 sm:$0xff]  }
 0x1bc   : > { %v7258_v44 = vpop.f32.mrb[27].mxu0  ;;  %v7277_v46 = vpop.f32.mrb[25].mxu1  ;;  %v7760_v40 = vld [vmem:[%s10275_s3 + $0x610] ss:$152 sps:$4 sm:$0xff]   ;;  %v7768_v42 = vld [vmem:[%s10275_s3 + $0x744] ss:$152 sps:$4 sm:$0xff]  }
 0x1bd   : > { %v3218_v45 = vadd.f32 %v7256_v41, %v3178_v32  ;;  %v7278_v47 = vadd.f32 %v7277_v46, %v7276_v43  ;;  %v7279_v48 = vpop.f32.mrb[26].mxu1  ;;  %v7748_v32 = vld [vmem:[%s10275_s3 + $0x3b0] ss:$152 sps:$4 sm:$0xff]   ;;  %v7765_v41 = vld [vmem:[%s10275_s3 + $0x72c] ss:$152 sps:$4 sm:$0xff]  }
 0x1be   : > { %v7280_v49 = vpop.f32.mrb[27].mxu1  ;;  %v7763_v43 = vld [vmem:[%s10275_s3 + $0x728] ss:$152 sps:$4 sm:$0xff]   ;;  %v7774_v46 = vld [vmem:[%s10275_s3 + $0x874] ss:$152 sps:$4 sm:$0xff]  }
 0x1bf   : > { %v3258_v50 = vadd.f32 %v7278_v47, %v3218_v45  ;;  %v7766_v44 = vld [vmem:[%s10275_s3 + $0x740] ss:$152 sps:$4 sm:$0xff]   ;;  %v7771_v45 = vld [vmem:[%s10275_s3 + $0x85c] ss:$152 sps:$4 sm:$0xff]   ;;  %v7772_v48 = vld [vmem:[%s10275_s3 + $0x870] ss:$152 sps:$4 sm:$0xff]  }
 0x1c0   : > { %v7769_v47 = vld [vmem:[%s10275_s3 + $0x858] ss:$152 sps:$4 sm:$0xff]   ;;  %v7777_v49 = vld [vmem:[%s10275_s3 + $0x1c] ss:$152 sps:$4 sm:$0xff]  }
 0x1d9   : > { %v7298_v51 = vpop.f32.mrb[28].mxu0 }
 0x1da   : > { %v7299_v52 = vpop.f32.mrb[29].mxu0 }
 0x1db   : > { %v7300_v53 = vadd.f32 %v7299_v52, %v7298_v51  ;;  %v7301_v54 = vpop.f32.mrb[30].mxu0  ;;  %v7320_v55 = vpop.f32.mrb[28].mxu1  ;;  %v7775_v51 = vld [vmem:[%s10275_s3 + $0x18] ss:$152 sps:$4 sm:$0xff]  }
 0x1dc   : > { %v7302_v56 = vpop.f32.mrb[31].mxu0  ;;  %v7321_v57 = vpop.f32.mrb[29].mxu1  ;;  %v7778_v52 = vld [vmem:[%s10275_s3 + $0x30] ss:$152 sps:$4 sm:$0xff]   ;;  %v7786_v54 = vld [vmem:[%s10275_s3 + $0x164] ss:$152 sps:$4 sm:$0xff]  }
 0x1dd   : > { %v3298_v58 = vadd.f32 %v7300_v53, %v3258_v50  ;;  %v7322_v59 = vadd.f32 %v7321_v57, %v7320_v55  ;;  %v7323_v61 = vpop.f32.mrb[30].mxu1  ;;  %v7780_v50 = vld [vmem:[%s10275_s3 + $0x34] ss:$152 sps:$4 sm:$0xff]   ;;  %v7781_v55 = vld [vmem:[%s10275_s3 + $0x148] ss:$152 sps:$4 sm:$0xff]  }
 0x1de   : > { %v7324_v62 = vpop.f32.mrb[31].mxu1  ;;  %v7783_v53 = vld [vmem:[%s10275_s3 + $0x14c] ss:$152 sps:$4 sm:$0xff]   ;;  %v7784_v56 = vld [vmem:[%s10275_s3 + $0x160] ss:$152 sps:$4 sm:$0xff]  }
 0x1df   : > { %v3338_v63 = vadd.f32 %v7322_v59, %v3298_v58  ;;  %v7789_v57 = vld [vmem:[%s10275_s3 + $0x27c] ss:$152 sps:$4 sm:$0xff]   ;;  %v7787_v59 = vld [vmem:[%s10275_s3 + $0x278] ss:$152 sps:$4 sm:$0xff]   ;;  %v7795_v62 = vld [vmem:[%s10275_s3 + $0x3ac] ss:$152 sps:$4 sm:$0xff]  }
 0x1e0   : > { %v7792_v58 = vld [vmem:[%s10275_s3 + $0x294] ss:$152 sps:$4 sm:$0xff]   ;;  %v7790_v61 = vld [vmem:[%s10275_s3 + $0x290] ss:$152 sps:$4 sm:$0xff]  }
 0x1f9   : > { %v7342_v0 = vpop.f32.mrb[32].mxu0 }
 0x1fa   : > { %v7343_v1 = vpop.f32.mrb[33].mxu0 }
 0x1fb   : > { %v7344_v2 = vadd.f32 %v7343_v1, %v7342_v0  ;;  %v7345_v3 = vpop.f32.mrb[34].mxu0  ;;  %v7364_v4 = vpop.f32.mrb[32].mxu1  ;;  %v7793_v0 = vld [vmem:[%s10275_s3 + $0x3a8] ss:$152 sps:$4 sm:$0xff]  }
 0x1fc   : > { %v7346_v5 = vpop.f32.mrb[35].mxu0  ;;  %v7365_v6 = vpop.f32.mrb[33].mxu1  ;;  %v7796_v1 = vld [vmem:[%s10275_s3 + $0x3c0] ss:$152 sps:$4 sm:$0xff]   ;;  %v7804_v3 = vld [vmem:[%s10275_s3 + $0x4f4] ss:$152 sps:$4 sm:$0xff]  }
 0x1fd   : > { %v3378_v7 = vadd.f32 %v7344_v2, %v3338_v63  ;;  %v7366_v8 = vadd.f32 %v7365_v6, %v7364_v4  ;;  %v7367_v9 = vpop.f32.mrb[34].mxu1  ;;  %v7798_v63 = vld [vmem:[%s10275_s3 + $0x3c4] ss:$152 sps:$4 sm:$0xff]   ;;  %v7799_v4 = vld [vmem:[%s10275_s3 + $0x4d8] ss:$152 sps:$4 sm:$0xff]  }
 0x1fe   : > { %v7368_v10 = vpop.f32.mrb[35].mxu1  ;;  %v7801_v2 = vld [vmem:[%s10275_s3 + $0x4dc] ss:$152 sps:$4 sm:$0xff]   ;;  %v7802_v5 = vld [vmem:[%s10275_s3 + $0x4f0] ss:$152 sps:$4 sm:$0xff]  }
 0x1ff   : > { %v3418_v11 = vadd.f32 %v7366_v8, %v3378_v7  ;;  %v7807_v6 = vld [vmem:[%s10275_s3 + $0x60c] ss:$152 sps:$4 sm:$0xff]   ;;  %v7805_v8 = vld [vmem:[%s10275_s3 + $0x608] ss:$152 sps:$4 sm:$0xff]   ;;  %v7813_v10 = vld [vmem:[%s10275_s3 + $0x73c] ss:$152 sps:$4 sm:$0xff]  }
 0x200   : > { %v7810_v7 = vld [vmem:[%s10275_s3 + $0x624] ss:$152 sps:$4 sm:$0xff]   ;;  %v7808_v9 = vld [vmem:[%s10275_s3 + $0x620] ss:$152 sps:$4 sm:$0xff]  }
 0x221   : > { %v3457_v12 = vpop.f32.mrb[36].mxu0 }
 0x222   : > { %v3458_v13 = vadd.f32 %v3457_v12, %v3418_v11  ;;  %v3459_v14 = vpop.f32.mrb[37].mxu0  ;;  %v7816_v11 = vld [vmem:[%s10275_s3 + $0x754] ss:$152 sps:$4 sm:$0xff]   ;;  %v7811_v12 = vld [vmem:[%s10275_s3 + $0x738] ss:$152 sps:$4 sm:$0xff]  }
 0x223   : > { %v3460_v15 = vpop.f32.mrb[38].mxu0  ;;  %v7819_v14 = vld [vmem:[%s10275_s3 + $0x86c] ss:$152 sps:$4 sm:$0xff]  }
 0x224   : > { %v3463_v16 = vmax.f32 %v3458_v13, 0.0  ;;  %v3461_v17 = vpop.f32.mrb[39].mxu0  ;;  %v7814_v13 = vld [vmem:[%s10275_s3 + $0x750] ss:$152 sps:$4 sm:$0xff]   ;;  %v7822_v15 = vld [vmem:[%s10275_s3 + $0x884] ss:$152 sps:$4 sm:$0xff]  }
 0x225   : > { %v7820_v17 = vld [vmem:[%s10275_s3 + $0x880] ss:$152 sps:$4 sm:$0xff]  }
 0x226   : > { %v9262_v20 = vpack.c.bf16 %v3463_v16, %v3463_v16  ;;  %v7817_v16 = vld [vmem:[%s10275_s3 + $0x868] ss:$152 sps:$4 sm:$0xff]  }
 0x228   : > { %5522 = vmatmul.mubr.bf16.vlgmr.msra.gmra.mrb[36].mxu1 %v9262_v20  ;;  %5604 = vmatmul.mubr.bf16.vlgmr.msra.gmra.mrb[40].mxu0 %v9262_v20 }
 0x229   : > { %5531 = vmatpush1.bf16.msra.mxu1 %v7727_v18  ;;  %5654 = vmatpush1.bf16.msra.mxu0 %v7730_v19  ;;  %v7825_v18 = vld [vmem:[%s10275_s3 + $0x2c] ss:$152 sps:$4 sm:$0xff]  }
 0x22a   : > { %5532 = vmatprep.subr.bf16.mxu1 %v7735_v21  ;;  %5655 = vmatprep.subr.bf16.mxu0 %v7738_v22  ;;  %v7828_v19 = vld [vmem:[%s10275_s3 + $0x44] ss:$152 sps:$4 sm:$0xff]   ;;  %v7823_v21 = vld [vmem:[%s10275_s3 + $0x28] ss:$152 sps:$4 sm:$0xff]  }
 0x22b   : > { %5562 = vmatprep.mubr.bf16.mxu1 %v8143_v60  ;;  %5685 = vmatprep.mubr.bf16.mxu0 %v8143_v60  ;;  %v7826_v22 = vld [vmem:[%s10275_s3 + $0x40] ss:$152 sps:$4 sm:$0xff]  }
 0x22d   : > { %5533 = vmatpush1.bf16.msra.mxu1 %v7733_v23  ;;  %5656 = vmatpush1.bf16.msra.mxu0 %v7736_v24  ;;  %v7831_v23 = vld [vmem:[%s10275_s3 + $0x15c] ss:$152 sps:$4 sm:$0xff]  }
 0x22e   : > { %5534 = vmatprep.subr.bf16.mxu1 %v7741_v25  ;;  %5657 = vmatprep.subr.bf16.mxu0 %v7744_v26  ;;  %v7834_v24 = vld [vmem:[%s10275_s3 + $0x174] ss:$152 sps:$4 sm:$0xff]   ;;  %v7829_v25 = vld [vmem:[%s10275_s3 + $0x158] ss:$152 sps:$4 sm:$0xff]  }
 0x22f   : > { %v7832_v26 = vld [vmem:[%s10275_s3 + $0x170] ss:$152 sps:$4 sm:$0xff]  }
 0x231   : > { %5535 = vmatpush1.bf16.msra.mxu1 %v7739_v27  ;;  %5658 = vmatpush1.bf16.msra.mxu0 %v7742_v28  ;;  %v7837_v27 = vld [vmem:[%s10275_s3 + $0x28c] ss:$152 sps:$4 sm:$0xff]  }
 0x232   : > { %5536 = vmatprep.subr.bf16.mxu1 %v7747_v29  ;;  %5659 = vmatprep.subr.bf16.mxu0 %v7750_v30  ;;  %v7840_v28 = vld [vmem:[%s10275_s3 + $0x2a4] ss:$152 sps:$4 sm:$0xff]   ;;  %v7835_v29 = vld [vmem:[%s10275_s3 + $0x288] ss:$152 sps:$4 sm:$0xff]  }
 0x233   : > { %v7838_v30 = vld [vmem:[%s10275_s3 + $0x2a0] ss:$152 sps:$4 sm:$0xff]  }
 0x235   : > { %5537 = vmatpush1.bf16.msra.mxu1 %v7745_v31  ;;  %5660 = vmatpush1.bf16.msra.mxu0 %v7748_v32  ;;  %v7843_v31 = vld [vmem:[%s10275_s3 + $0x3bc] ss:$152 sps:$4 sm:$0xff]  }
 0x236   : > { %5538 = vmatprep.subr.bf16.mxu1 %v7753_v33  ;;  %5661 = vmatprep.subr.bf16.mxu0 %v7756_v34  ;;  %v7846_v32 = vld [vmem:[%s10275_s3 + $0x3d4] ss:$152 sps:$4 sm:$0xff]   ;;  %v7841_v33 = vld [vmem:[%s10275_s3 + $0x3b8] ss:$152 sps:$4 sm:$0xff]  }
 0x237   : > { %v7844_v34 = vld [vmem:[%s10275_s3 + $0x3d0] ss:$152 sps:$4 sm:$0xff]  }
 0x239   : > { %5539 = vmatpush1.bf16.msra.mxu1 %v7751_v35  ;;  %5662 = vmatpush1.bf16.msra.mxu0 %v7754_v36  ;;  %v7849_v35 = vld [vmem:[%s10275_s3 + $0x4ec] ss:$152 sps:$4 sm:$0xff]  }
 0x23a   : > { %5540 = vmatprep.subr.bf16.mxu1 %v7759_v37  ;;  %5663 = vmatprep.subr.bf16.mxu0 %v7762_v38  ;;  %v7852_v36 = vld [vmem:[%s10275_s3 + $0x504] ss:$152 sps:$4 sm:$0xff]   ;;  %v7847_v37 = vld [vmem:[%s10275_s3 + $0x4e8] ss:$152 sps:$4 sm:$0xff]  }
 0x23b   : > { %v7850_v38 = vld [vmem:[%s10275_s3 + $0x500] ss:$152 sps:$4 sm:$0xff]  }
 0x23d   : > { %5541 = vmatpush1.bf16.msra.mxu1 %v7757_v39  ;;  %5664 = vmatpush1.bf16.msra.mxu0 %v7760_v40  ;;  %v7855_v39 = vld [vmem:[%s10275_s3 + $0x61c] ss:$152 sps:$4 sm:$0xff]  }
 0x23e   : > { %5542 = vmatprep.subr.bf16.mxu1 %v7765_v41  ;;  %5665 = vmatprep.subr.bf16.mxu0 %v7768_v42  ;;  %v7858_v40 = vld [vmem:[%s10275_s3 + $0x634] ss:$152 sps:$4 sm:$0xff]   ;;  %v7853_v41 = vld [vmem:[%s10275_s3 + $0x618] ss:$152 sps:$4 sm:$0xff]  }
 0x23f   : > { %v7856_v42 = vld [vmem:[%s10275_s3 + $0x630] ss:$152 sps:$4 sm:$0xff]  }
 0x241   : > { %5543 = vmatpush1.bf16.msra.mxu1 %v7763_v43  ;;  %5666 = vmatpush1.bf16.msra.mxu0 %v7766_v44  ;;  %v7861_v43 = vld [vmem:[%s10275_s3 + $0x74c] ss:$152 sps:$4 sm:$0xff]  }
 0x242   : > { %5544 = vmatprep.subr.bf16.mxu1 %v7771_v45  ;;  %5667 = vmatprep.subr.bf16.mxu0 %v7774_v46  ;;  %v7864_v44 = vld [vmem:[%s10275_s3 + $0x764] ss:$152 sps:$4 sm:$0xff]   ;;  %v7859_v45 = vld [vmem:[%s10275_s3 + $0x748] ss:$152 sps:$4 sm:$0xff]  }
 0x243   : > { %v7862_v46 = vld [vmem:[%s10275_s3 + $0x760] ss:$152 sps:$4 sm:$0xff]  }
 0x245   : > { %5545 = vmatpush1.bf16.msra.mxu1 %v7769_v47  ;;  %5668 = vmatpush1.bf16.msra.mxu0 %v7772_v48  ;;  %v7867_v47 = vld [vmem:[%s10275_s3 + $0x87c] ss:$152 sps:$4 sm:$0xff]  }
 0x246   : > { %5612 = vmatprep.subr.bf16.mxu1 %v7777_v49  ;;  %5735 = vmatprep.subr.bf16.mxu0 %v7780_v50  ;;  %v7870_v48 = vld [vmem:[%s10275_s3 + $0x894] ss:$152 sps:$4 sm:$0xff]   ;;  %v7865_v49 = vld [vmem:[%s10275_s3 + $0x878] ss:$152 sps:$4 sm:$0xff]  }
 0x247   : > { %v7868_v50 = vld [vmem:[%s10275_s3 + $0x890] ss:$152 sps:$4 sm:$0xff]  }
 0x248   : > { %5563 = vmatmul.mubr.bf16.vlgmr.msra.gmra.mrb[40].mxu1 %v9262_v20  ;;  %5686 = vmatmul.mubr.bf16.vlgmr.msra.gmra.mrb[44].mxu0 %v9262_v20 }
 0x249   : > { %5613 = vmatpush1.bf16.msra.mxu1 %v7775_v51  ;;  %5736 = vmatpush1.bf16.msra.mxu0 %v7778_v52  ;;  %v7873_v51 = vld [vmem:[%s10275_s3 + $0x3c] ss:$152 sps:$4 sm:$0xff]  }
 0x24a   : > { %5614 = vmatprep.subr.bf16.mxu1 %v7783_v53  ;;  %5737 = vmatprep.subr.bf16.mxu0 %v7786_v54  ;;  %v7876_v52 = vld [vmem:[%s10275_s3 + $0x54] ss:$152 sps:$4 sm:$0xff]   ;;  %v7871_v53 = vld [vmem:[%s10275_s3 + $0x38] ss:$152 sps:$4 sm:$0xff]  }
 0x24b   : > { %5644 = vmatprep.mubr.bf16.mxu1 %v8143_v60  ;;  %5767 = vmatprep.mubr.bf16.mxu0 %v8143_v60  ;;  %v7874_v54 = vld [vmem:[%s10275_s3 + $0x50] ss:$152 sps:$4 sm:$0xff]  }
 0x24d   : > { %5615 = vmatpush1.bf16.msra.mxu1 %v7781_v55  ;;  %5738 = vmatpush1.bf16.msra.mxu0 %v7784_v56  ;;  %v7879_v55 = vld [vmem:[%s10275_s3 + $0x16c] ss:$152 sps:$4 sm:$0xff]  }
 0x24e   : > { %5616 = vmatprep.subr.bf16.mxu1 %v7789_v57  ;;  %5739 = vmatprep.subr.bf16.mxu0 %v7792_v58  ;;  %v7882_v56 = vld [vmem:[%s10275_s3 + $0x184] ss:$152 sps:$4 sm:$0xff]   ;;  %v7877_v57 = vld [vmem:[%s10275_s3 + $0x168] ss:$152 sps:$4 sm:$0xff]  }
 0x24f   : > { %v7880_v58 = vld [vmem:[%s10275_s3 + $0x180] ss:$152 sps:$4 sm:$0xff]  }
 0x251   : > { %5617 = vmatpush1.bf16.msra.mxu1 %v7787_v59  ;;  %5740 = vmatpush1.bf16.msra.mxu0 %v7790_v61  ;;  %v7885_v59 = vld [vmem:[%s10275_s3 + $0x29c] ss:$152 sps:$4 sm:$0xff]  }
 0x252   : > { %5618 = vmatprep.subr.bf16.mxu1 %v7795_v62  ;;  %5741 = vmatprep.subr.bf16.mxu0 %v7798_v63  ;;  %v7888_v61 = vld [vmem:[%s10275_s3 + $0x2b4] ss:$152 sps:$4 sm:$0xff]   ;;  %v7883_v62 = vld [vmem:[%s10275_s3 + $0x298] ss:$152 sps:$4 sm:$0xff]  }
 0x253   : > { %v7886_v63 = vld [vmem:[%s10275_s3 + $0x2b0] ss:$152 sps:$4 sm:$0xff]  }
 0x255   : > { %5619 = vmatpush1.bf16.msra.mxu1 %v7793_v0  ;;  %5742 = vmatpush1.bf16.msra.mxu0 %v7796_v1  ;;  %v7891_v0 = vld [vmem:[%s10275_s3 + $0x3cc] ss:$152 sps:$4 sm:$0xff]  }
 0x256   : > { %5620 = vmatprep.subr.bf16.mxu1 %v7801_v2  ;;  %5743 = vmatprep.subr.bf16.mxu0 %v7804_v3  ;;  %v7894_v1 = vld [vmem:[%s10275_s3 + $0x3e4] ss:$152 sps:$4 sm:$0xff]   ;;  %v7889_v2 = vld [vmem:[%s10275_s3 + $0x3c8] ss:$152 sps:$4 sm:$0xff]  }
 0x257   : > { %v7892_v3 = vld [vmem:[%s10275_s3 + $0x3e0] ss:$152 sps:$4 sm:$0xff]  }
 0x259   : > { %5621 = vmatpush1.bf16.msra.mxu1 %v7799_v4  ;;  %5744 = vmatpush1.bf16.msra.mxu0 %v7802_v5  ;;  %v7897_v4 = vld [vmem:[%s10275_s3 + $0x4fc] ss:$152 sps:$4 sm:$0xff]  }
 0x25a   : > { %5622 = vmatprep.subr.bf16.mxu1 %v7807_v6  ;;  %5745 = vmatprep.subr.bf16.mxu0 %v7810_v7  ;;  %v7900_v5 = vld [vmem:[%s10275_s3 + $0x514] ss:$152 sps:$4 sm:$0xff]   ;;  %v7895_v6 = vld [vmem:[%s10275_s3 + $0x4f8] ss:$152 sps:$4 sm:$0xff]  }
 0x25b   : > { %v7898_v7 = vld [vmem:[%s10275_s3 + $0x510] ss:$152 sps:$4 sm:$0xff]  }
 0x25d   : > { %5623 = vmatpush1.bf16.msra.mxu1 %v7805_v8  ;;  %5746 = vmatpush1.bf16.msra.mxu0 %v7808_v9  ;;  %v7903_v8 = vld [vmem:[%s10275_s3 + $0x62c] ss:$152 sps:$4 sm:$0xff]  }
 0x25e   : > { %5624 = vmatprep.subr.bf16.mxu1 %v7813_v10  ;;  %5747 = vmatprep.subr.bf16.mxu0 %v7816_v11  ;;  %v7906_v9 = vld [vmem:[%s10275_s3 + $0x644] ss:$152 sps:$4 sm:$0xff]   ;;  %v7901_v10 = vld [vmem:[%s10275_s3 + $0x628] ss:$152 sps:$4 sm:$0xff]  }
 0x25f   : > { %v7904_v11 = vld [vmem:[%s10275_s3 + $0x640] ss:$152 sps:$4 sm:$0xff]  }
 0x261   : > { %5625 = vmatpush1.bf16.msra.mxu1 %v7811_v12  ;;  %5748 = vmatpush1.bf16.msra.mxu0 %v7814_v13  ;;  %v7909_v12 = vld [vmem:[%s10275_s3 + $0x75c] ss:$152 sps:$4 sm:$0xff]  }
 0x262   : > { %5626 = vmatprep.subr.bf16.mxu1 %v7819_v14  ;;  %5749 = vmatprep.subr.bf16.mxu0 %v7822_v15  ;;  %v7912_v13 = vld [vmem:[%s10275_s3 + $0x774] ss:$152 sps:$4 sm:$0xff]   ;;  %v7907_v14 = vld [vmem:[%s10275_s3 + $0x758] ss:$152 sps:$4 sm:$0xff]  }
 0x263   : > { %v7910_v15 = vld [vmem:[%s10275_s3 + $0x770] ss:$152 sps:$4 sm:$0xff]  }
 0x265   : > { %5627 = vmatpush1.bf16.msra.mxu1 %v7817_v16  ;;  %5750 = vmatpush1.bf16.msra.mxu0 %v7820_v17  ;;  %v7915_v16 = vld [vmem:[%s10275_s3 + $0x88c] ss:$152 sps:$4 sm:$0xff]  }
 0x266   : > { %5694 = vmatprep.subr.bf16.mxu1 %v7825_v18  ;;  %5817 = vmatprep.subr.bf16.mxu0 %v7828_v19  ;;  %v7918_v17 = vld [vmem:[%s10275_s3 + $0x8a4] ss:$152 sps:$4 sm:$0xff]   ;;  %v7913_v18 = vld [vmem:[%s10275_s3 + $0x888] ss:$152 sps:$4 sm:$0xff]  }
 0x267   : > { %v7916_v19 = vld [vmem:[%s10275_s3 + $0x8a0] ss:$152 sps:$4 sm:$0xff]  }
 0x268   : > { %5645 = vmatmul.mubr.bf16.vlgmr.msra.gmra.mrb[44].mxu1 %v9262_v20  ;;  %5768 = vmatmul.mubr.bf16.vlgmr.msra.gmra.mrb[48].mxu0 %v9262_v20 }
 0x269   : > { %5695 = vmatpush1.bf16.msra.mxu1 %v7823_v21  ;;  %5818 = vmatpush1.bf16.msra.mxu0 %v7826_v22  ;;  %v7921_v21 = vld [vmem:[%s10275_s3 + $0x4c] ss:$152 sps:$4 sm:$0xff]  }
 0x26a   : > { %5696 = vmatprep.subr.bf16.mxu1 %v7831_v23  ;;  %5819 = vmatprep.subr.bf16.mxu0 %v7834_v24  ;;  %v7924_v22 = vld [vmem:[%s10275_s3 + $0x64] ss:$152 sps:$4 sm:$0xff]   ;;  %v7919_v23 = vld [vmem:[%s10275_s3 + $0x48] ss:$152 sps:$4 sm:$0xff]  }
 0x26b   : > { %5726 = vmatprep.mubr.bf16.mxu1 %v8143_v60  ;;  %5849 = vmatprep.mubr.bf16.mxu0 %v8143_v60  ;;  %v7922_v24 = vld [vmem:[%s10275_s3 + $0x60] ss:$152 sps:$4 sm:$0xff]  }
 0x26d   : > { %5697 = vmatpush1.bf16.msra.mxu1 %v7829_v25  ;;  %5820 = vmatpush1.bf16.msra.mxu0 %v7832_v26  ;;  %v7927_v25 = vld [vmem:[%s10275_s3 + $0x17c] ss:$152 sps:$4 sm:$0xff]  }
 0x26e   : > { %5698 = vmatprep.subr.bf16.mxu1 %v7837_v27  ;;  %5821 = vmatprep.subr.bf16.mxu0 %v7840_v28  ;;  %v7930_v26 = vld [vmem:[%s10275_s3 + $0x194] ss:$152 sps:$4 sm:$0xff]   ;;  %v7925_v27 = vld [vmem:[%s10275_s3 + $0x178] ss:$152 sps:$4 sm:$0xff]  }
 0x26f   : > { %v7928_v28 = vld [vmem:[%s10275_s3 + $0x190] ss:$152 sps:$4 sm:$0xff]  }
 0x271   : > { %5699 = vmatpush1.bf16.msra.mxu1 %v7835_v29  ;;  %5822 = vmatpush1.bf16.msra.mxu0 %v7838_v30  ;;  %v7933_v29 = vld [vmem:[%s10275_s3 + $0x2ac] ss:$152 sps:$4 sm:$0xff]  }
 0x272   : > { %5700 = vmatprep.subr.bf16.mxu1 %v7843_v31  ;;  %5823 = vmatprep.subr.bf16.mxu0 %v7846_v32  ;;  %v7936_v30 = vld [vmem:[%s10275_s3 + $0x2c4] ss:$152 sps:$4 sm:$0xff]   ;;  %v7931_v31 = vld [vmem:[%s10275_s3 + $0x2a8] ss:$152 sps:$4 sm:$0xff]  }
 0x273   : > { %v7934_v32 = vld [vmem:[%s10275_s3 + $0x2c0] ss:$152 sps:$4 sm:$0xff]  }
 0x275   : > { %5701 = vmatpush1.bf16.msra.mxu1 %v7841_v33  ;;  %5824 = vmatpush1.bf16.msra.mxu0 %v7844_v34  ;;  %v7939_v33 = vld [vmem:[%s10275_s3 + $0x3dc] ss:$152 sps:$4 sm:$0xff]  }
 0x276   : > { %5702 = vmatprep.subr.bf16.mxu1 %v7849_v35  ;;  %5825 = vmatprep.subr.bf16.mxu0 %v7852_v36  ;;  %v7942_v34 = vld [vmem:[%s10275_s3 + $0x3f4] ss:$152 sps:$4 sm:$0xff]   ;;  %v7937_v35 = vld [vmem:[%s10275_s3 + $0x3d8] ss:$152 sps:$4 sm:$0xff]  }
 0x277   : > { %v7940_v36 = vld [vmem:[%s10275_s3 + $0x3f0] ss:$152 sps:$4 sm:$0xff]  }
 0x279   : > { %5703 = vmatpush1.bf16.msra.mxu1 %v7847_v37  ;;  %5826 = vmatpush1.bf16.msra.mxu0 %v7850_v38  ;;  %v7945_v37 = vld [vmem:[%s10275_s3 + $0x50c] ss:$152 sps:$4 sm:$0xff]  }
 0x27a   : > { %5704 = vmatprep.subr.bf16.mxu1 %v7855_v39  ;;  %5827 = vmatprep.subr.bf16.mxu0 %v7858_v40  ;;  %v7948_v38 = vld [vmem:[%s10275_s3 + $0x524] ss:$152 sps:$4 sm:$0xff]   ;;  %v7943_v39 = vld [vmem:[%s10275_s3 + $0x508] ss:$152 sps:$4 sm:$0xff]  }
 0x27b   : > { %v7946_v40 = vld [vmem:[%s10275_s3 + $0x520] ss:$152 sps:$4 sm:$0xff]  }
 0x27d   : > { %5705 = vmatpush1.bf16.msra.mxu1 %v7853_v41  ;;  %5828 = vmatpush1.bf16.msra.mxu0 %v7856_v42  ;;  %v7951_v41 = vld [vmem:[%s10275_s3 + $0x63c] ss:$152 sps:$4 sm:$0xff]  }
 0x27e   : > { %5706 = vmatprep.subr.bf16.mxu1 %v7861_v43  ;;  %5829 = vmatprep.subr.bf16.mxu0 %v7864_v44  ;;  %v7954_v42 = vld [vmem:[%s10275_s3 + $0x654] ss:$152 sps:$4 sm:$0xff]   ;;  %v7949_v43 = vld [vmem:[%s10275_s3 + $0x638] ss:$152 sps:$4 sm:$0xff]  }
 0x27f   : > { %v7952_v44 = vld [vmem:[%s10275_s3 + $0x650] ss:$152 sps:$4 sm:$0xff]  }
 0x281   : > { %5707 = vmatpush1.bf16.msra.mxu1 %v7859_v45  ;;  %5830 = vmatpush1.bf16.msra.mxu0 %v7862_v46  ;;  %v7957_v45 = vld [vmem:[%s10275_s3 + $0x76c] ss:$152 sps:$4 sm:$0xff]  }
 0x282   : > { %5708 = vmatprep.subr.bf16.mxu1 %v7867_v47  ;;  %5831 = vmatprep.subr.bf16.mxu0 %v7870_v48  ;;  %v7960_v46 = vld [vmem:[%s10275_s3 + $0x784] ss:$152 sps:$4 sm:$0xff]   ;;  %v7955_v47 = vld [vmem:[%s10275_s3 + $0x768] ss:$152 sps:$4 sm:$0xff]  }
 0x283   : > { %v7958_v48 = vld [vmem:[%s10275_s3 + $0x780] ss:$152 sps:$4 sm:$0xff]  }
 0x285   : > { %5709 = vmatpush1.bf16.msra.mxu1 %v7865_v49  ;;  %5832 = vmatpush1.bf16.msra.mxu0 %v7868_v50  ;;  %v7963_v49 = vld [vmem:[%s10275_s3 + $0x89c] ss:$152 sps:$4 sm:$0xff]  }
 0x286   : > { %5776 = vmatprep.subr.bf16.mxu1 %v7873_v51  ;;  %5899 = vmatprep.subr.bf16.mxu0 %v7876_v52  ;;  %v7966_v50 = vld [vmem:[%s10275_s3 + $0x8b4] ss:$152 sps:$4 sm:$0xff]   ;;  %v7961_v51 = vld [vmem:[%s10275_s3 + $0x898] ss:$152 sps:$4 sm:$0xff]  }
 0x287   : > { %v7964_v52 = vld [vmem:[%s10275_s3 + $0x8b0] ss:$152 sps:$4 sm:$0xff]  }
 0x288   : > { %5727 = vmatmul.mubr.bf16.vlgmr.msra.gmra.mrb[48].mxu1 %v9262_v20  ;;  %5850 = vmatmul.mubr.bf16.vlgmr.msra.gmra.mrb[52].mxu0 %v9262_v20 }
 0x289   : > { %5777 = vmatpush1.bf16.msra.mxu1 %v7871_v53  ;;  %5900 = vmatpush1.bf16.msra.mxu0 %v7874_v54  ;;  %v7969_v53 = vld [vmem:[%s10275_s3 + $0x5c] ss:$152 sps:$4 sm:$0xff]  }
 0x28a   : > { %5778 = vmatprep.subr.bf16.mxu1 %v7879_v55  ;;  %5901 = vmatprep.subr.bf16.mxu0 %v7882_v56  ;;  %v7972_v54 = vld [vmem:[%s10275_s3 + $0x74] ss:$152 sps:$4 sm:$0xff]   ;;  %v7967_v55 = vld [vmem:[%s10275_s3 + $0x58] ss:$152 sps:$4 sm:$0xff]  }
 0x28b   : > { %5808 = vmatprep.mubr.bf16.mxu1 %v8143_v60  ;;  %5931 = vmatprep.mubr.bf16.mxu0 %v8143_v60  ;;  %v7970_v56 = vld [vmem:[%s10275_s3 + $0x70] ss:$152 sps:$4 sm:$0xff]  }
 0x28d   : > { %5779 = vmatpush1.bf16.msra.mxu1 %v7877_v57  ;;  %5902 = vmatpush1.bf16.msra.mxu0 %v7880_v58  ;;  %v7975_v57 = vld [vmem:[%s10275_s3 + $0x18c] ss:$152 sps:$4 sm:$0xff]  }
 0x28e   : > { %5780 = vmatprep.subr.bf16.mxu1 %v7885_v59  ;;  %5903 = vmatprep.subr.bf16.mxu0 %v7888_v61  ;;  %v7978_v58 = vld [vmem:[%s10275_s3 + $0x1a4] ss:$152 sps:$4 sm:$0xff]   ;;  %v7973_v59 = vld [vmem:[%s10275_s3 + $0x188] ss:$152 sps:$4 sm:$0xff]  }
 0x28f   : > { %v7976_v61 = vld [vmem:[%s10275_s3 + $0x1a0] ss:$152 sps:$4 sm:$0xff]  }
 0x291   : > { %5781 = vmatpush1.bf16.msra.mxu1 %v7883_v62  ;;  %5904 = vmatpush1.bf16.msra.mxu0 %v7886_v63  ;;  %v7981_v62 = vld [vmem:[%s10275_s3 + $0x2bc] ss:$152 sps:$4 sm:$0xff]  }
 0x292   : > { %5782 = vmatprep.subr.bf16.mxu1 %v7891_v0  ;;  %5905 = vmatprep.subr.bf16.mxu0 %v7894_v1  ;;  %v7984_v63 = vld [vmem:[%s10275_s3 + $0x2d4] ss:$152 sps:$4 sm:$0xff]   ;;  %v7979_v0 = vld [vmem:[%s10275_s3 + $0x2b8] ss:$152 sps:$4 sm:$0xff]  }
 0x293   : > { %v7982_v1 = vld [vmem:[%s10275_s3 + $0x2d0] ss:$152 sps:$4 sm:$0xff]  }
 0x295   : > { %5783 = vmatpush1.bf16.msra.mxu1 %v7889_v2  ;;  %5906 = vmatpush1.bf16.msra.mxu0 %v7892_v3  ;;  %v7987_v2 = vld [vmem:[%s10275_s3 + $0x3ec] ss:$152 sps:$4 sm:$0xff]  }
 0x296   : > { %5784 = vmatprep.subr.bf16.mxu1 %v7897_v4  ;;  %5907 = vmatprep.subr.bf16.mxu0 %v7900_v5  ;;  %v7990_v3 = vld [vmem:[%s10275_s3 + $0x404] ss:$152 sps:$4 sm:$0xff]   ;;  %v7985_v4 = vld [vmem:[%s10275_s3 + $0x3e8] ss:$152 sps:$4 sm:$0xff]  }
 0x297   : > { %v7988_v5 = vld [vmem:[%s10275_s3 + $0x400] ss:$152 sps:$4 sm:$0xff]  }
 0x299   : > { %5785 = vmatpush1.bf16.msra.mxu1 %v7895_v6  ;;  %5908 = vmatpush1.bf16.msra.mxu0 %v7898_v7  ;;  %v7993_v6 = vld [vmem:[%s10275_s3 + $0x51c] ss:$152 sps:$4 sm:$0xff]  }
 0x29a   : > { %5786 = vmatprep.subr.bf16.mxu1 %v7903_v8  ;;  %5909 = vmatprep.subr.bf16.mxu0 %v7906_v9  ;;  %v7996_v7 = vld [vmem:[%s10275_s3 + $0x534] ss:$152 sps:$4 sm:$0xff]   ;;  %v7991_v8 = vld [vmem:[%s10275_s3 + $0x518] ss:$152 sps:$4 sm:$0xff]  }
 0x29b   : > { %v7994_v9 = vld [vmem:[%s10275_s3 + $0x530] ss:$152 sps:$4 sm:$0xff]  }
 0x29d   : > { %5787 = vmatpush1.bf16.msra.mxu1 %v7901_v10  ;;  %5910 = vmatpush1.bf16.msra.mxu0 %v7904_v11  ;;  %v7999_v10 = vld [vmem:[%s10275_s3 + $0x64c] ss:$152 sps:$4 sm:$0xff]  }
 0x29e   : > { %5788 = vmatprep.subr.bf16.mxu1 %v7909_v12  ;;  %5911 = vmatprep.subr.bf16.mxu0 %v7912_v13  ;;  %v8002_v11 = vld [vmem:[%s10275_s3 + $0x664] ss:$152 sps:$4 sm:$0xff]   ;;  %v7997_v12 = vld [vmem:[%s10275_s3 + $0x648] ss:$152 sps:$4 sm:$0xff]  }
 0x29f   : > { %v8000_v13 = vld [vmem:[%s10275_s3 + $0x660] ss:$152 sps:$4 sm:$0xff]  }
 0x2a1   : > { %5789 = vmatpush1.bf16.msra.mxu1 %v7907_v14  ;;  %5912 = vmatpush1.bf16.msra.mxu0 %v7910_v15  ;;  %v8005_v14 = vld [vmem:[%s10275_s3 + $0x77c] ss:$152 sps:$4 sm:$0xff]  }
 0x2a2   : > { %5790 = vmatprep.subr.bf16.mxu1 %v7915_v16  ;;  %5913 = vmatprep.subr.bf16.mxu0 %v7918_v17  ;;  %v8008_v15 = vld [vmem:[%s10275_s3 + $0x794] ss:$152 sps:$4 sm:$0xff]   ;;  %v8003_v16 = vld [vmem:[%s10275_s3 + $0x778] ss:$152 sps:$4 sm:$0xff]  }
 0x2a3   : > { %v8006_v17 = vld [vmem:[%s10275_s3 + $0x790] ss:$152 sps:$4 sm:$0xff]  }
 0x2a5   : > { %5791 = vmatpush1.bf16.msra.mxu1 %v7913_v18  ;;  %5914 = vmatpush1.bf16.msra.mxu0 %v7916_v19  ;;  %v8011_v18 = vld [vmem:[%s10275_s3 + $0x8ac] ss:$152 sps:$4 sm:$0xff]  }
 0x2a6   : > { %5858 = vmatprep.subr.bf16.mxu1 %v7921_v21  ;;  %5981 = vmatprep.subr.bf16.mxu0 %v7924_v22  ;;  %v8014_v19 = vld [vmem:[%s10275_s3 + $0x8c4] ss:$152 sps:$4 sm:$0xff]   ;;  %v8009_v21 = vld [vmem:[%s10275_s3 + $0x8a8] ss:$152 sps:$4 sm:$0xff]  }
 0x2a7   : > { %v8012_v22 = vld [vmem:[%s10275_s3 + $0x8c0] ss:$152 sps:$4 sm:$0xff]  }
 0x2a8   : > { %5809 = vmatmul.mubr.bf16.vlgmr.msra.gmra.mrb[52].mxu1 %v9262_v20  ;;  %5932 = vmatmul.mubr.bf16.vlgmr.msra.gmra.mrb[56].mxu0 %v9262_v20 }
 0x2a9   : > { %5859 = vmatpush1.bf16.msra.mxu1 %v7919_v23  ;;  %5982 = vmatpush1.bf16.msra.mxu0 %v7922_v24  ;;  %v8017_v23 = vld [vmem:[%s10275_s3 + $0x6c] ss:$152 sps:$4 sm:$0xff]  }
 0x2aa   : > { %5860 = vmatprep.subr.bf16.mxu1 %v7927_v25  ;;  %5983 = vmatprep.subr.bf16.mxu0 %v7930_v26  ;;  %v8020_v24 = vld [vmem:[%s10275_s3 + $0x84] ss:$152 sps:$4 sm:$0xff]   ;;  %v8015_v25 = vld [vmem:[%s10275_s3 + $0x68] ss:$152 sps:$4 sm:$0xff]  }
 0x2ab   : > { %5890 = vmatprep.mubr.bf16.mxu1 %v8143_v60  ;;  %6013 = vmatprep.mubr.bf16.mxu0 %v8143_v60  ;;  %v8018_v26 = vld [vmem:[%s10275_s3 + $0x80] ss:$152 sps:$4 sm:$0xff]  }
 0x2ad   : > { %5861 = vmatpush1.bf16.msra.mxu1 %v7925_v27  ;;  %5984 = vmatpush1.bf16.msra.mxu0 %v7928_v28  ;;  %v8023_v27 = vld [vmem:[%s10275_s3 + $0x19c] ss:$152 sps:$4 sm:$0xff]  }
 0x2ae   : > { %5862 = vmatprep.subr.bf16.mxu1 %v7933_v29  ;;  %5985 = vmatprep.subr.bf16.mxu0 %v7936_v30  ;;  %v8026_v28 = vld [vmem:[%s10275_s3 + $0x1b4] ss:$152 sps:$4 sm:$0xff]   ;;  %v8021_v29 = vld [vmem:[%s10275_s3 + $0x198] ss:$152 sps:$4 sm:$0xff]  }
 0x2af   : > { %v8024_v30 = vld [vmem:[%s10275_s3 + $0x1b0] ss:$152 sps:$4 sm:$0xff]  }
 0x2b1   : > { %5863 = vmatpush1.bf16.msra.mxu1 %v7931_v31  ;;  %5986 = vmatpush1.bf16.msra.mxu0 %v7934_v32  ;;  %v8029_v31 = vld [vmem:[%s10275_s3 + $0x2cc] ss:$152 sps:$4 sm:$0xff]  }
 0x2b2   : > { %5864 = vmatprep.subr.bf16.mxu1 %v7939_v33  ;;  %5987 = vmatprep.subr.bf16.mxu0 %v7942_v34  ;;  %v8032_v32 = vld [vmem:[%s10275_s3 + $0x2e4] ss:$152 sps:$4 sm:$0xff]   ;;  %v3779_v33 = vlaneseq  ;;  %v8027_v34 = vld [vmem:[%s10275_s3 + $0x2c8] ss:$152 sps:$4 sm:$0xff]  }
 0x2b5   : > { %5865 = vmatpush1.bf16.msra.mxu1 %v7937_v35  ;;  %5988 = vmatpush1.bf16.msra.mxu0 %v7940_v36  ;;  %v8030_v35 = vld [vmem:[%s10275_s3 + $0x2e0] ss:$152 sps:$4 sm:$0xff]   ;;  %v8035_v36 = vld [vmem:[%s10275_s3 + $0x3fc] ss:$152 sps:$4 sm:$0xff]  }
 0x2b6   : > { %5866 = vmatprep.subr.bf16.mxu1 %v7945_v37  ;;  %5989 = vmatprep.subr.bf16.mxu0 %v7948_v38  ;;  %v8038_v37 = vld [vmem:[%s10275_s3 + $0x414] ss:$152 sps:$4 sm:$0xff]   ;;  %v9898_v38 = vshrl.u32 %v3779_v33, 7 }
 0x2b7   : > { %v8092_v33 = vld [vmem:[%s10275_s3 + $0x554] ss:$152 sps:$4 sm:$0xff]  }
 0x2b9   : > { %5867 = vmatpush1.bf16.msra.mxu1 %v7943_v39  ;;  %5990 = vmatpush1.bf16.msra.mxu0 %v7946_v40  ;;  %v8033_v39 = vld [vmem:[%s10275_s3 + $0x3f8] ss:$152 sps:$4 sm:$0xff]  }
 0x2ba   : > { %5868 = vmatprep.subr.bf16.mxu1 %v7951_v41  ;;  %5991 = vmatprep.subr.bf16.mxu0 %v7954_v42  ;;  %v8036_v40 = vld [vmem:[%s10275_s3 + $0x410] ss:$152 sps:$4 sm:$0xff]   ;;  %v8041_v41 = vld [vmem:[%s10275_s3 + $0x52c] ss:$152 sps:$4 sm:$0xff]  }
 0x2bb   : > { %v8044_v42 = vld [vmem:[%s10275_s3 + $0x544] ss:$152 sps:$4 sm:$0xff]  }
 0x2bd   : > { %5869 = vmatpush1.bf16.msra.mxu1 %v7949_v43  ;;  %5992 = vmatpush1.bf16.msra.mxu0 %v7952_v44  ;;  %v8039_v43 = vld [vmem:[%s10275_s3 + $0x528] ss:$152 sps:$4 sm:$0xff]   ;;  %v9916_v44 = vsub.s32 0, %v9898_v38 }
 0x2be   : > { %5870 = vmatprep.subr.bf16.mxu1 %v7957_v45  ;;  %5993 = vmatprep.subr.bf16.mxu0 %v7960_v46  ;;  %v9919_v45 = vsub.s32 4, %v9898_v38  ;;  %v8042_v46 = vld [vmem:[%s10275_s3 + $0x540] ss:$152 sps:$4 sm:$0xff]  }
 0x2c1   : > { %5871 = vmatpush1.bf16.msra.mxu1 %v7955_v47  ;;  %5994 = vmatpush1.bf16.msra.mxu0 %v7958_v48  ;;  %v9927_v47 = vld [vmem:[%s10276_s4] sm:$0xff]  ;;  %v9930_v48 = vsub.s32 1, %v9898_v38 }
 0x2c2   : > { %5872 = vmatprep.subr.bf16.mxu1 %v7963_v49  ;;  %5995 = vmatprep.subr.bf16.mxu0 %v7966_v50  ;;  %v9933_v49 = vsub.s32 5, %v9898_v38  ;;  %v8047_v50 = vld [vmem:[%s10275_s3 + $0x65c] ss:$152 sps:$4 sm:$0xff]  }
 0x2c5   : > { %5873 = vmatpush1.bf16.msra.mxu1 %v7961_v51  ;;  %5996 = vmatpush1.bf16.msra.mxu0 %v7964_v52  ;;  %v8050_v51 = vld [vmem:[%s10275_s3 + $0x674] ss:$152 sps:$4 sm:$0xff]   ;;  %v3782_v52 = vrot.slane %v9927_v47, %v9916_v44 }
 0x2c6   : > { %5940 = vmatprep.subr.bf16.mxu1 %v7969_v53  ;;  %6063 = vmatprep.subr.bf16.mxu0 %v7972_v54  ;;  %v3798_v53 = vrot.slane %v9927_v47, %v9919_v45  ;;  %v8045_v54 = vld [vmem:[%s10275_s3 + $0x658] ss:$152 sps:$4 sm:$0xff]  }
 0x2c8   : > { %5891 = vmatmul.mubr.bf16.vlgmr.msra.gmra.mrb[56].mxu1 %v9262_v20  ;;  %6014 = vmatmul.mubr.bf16.vlgmr.msra.gmra.mrb[60].mxu0 %v9262_v20 }
 0x2c9   : > { %5941 = vmatpush1.bf16.msra.mxu1 %v7967_v55  ;;  %6064 = vmatpush1.bf16.msra.mxu0 %v7970_v56  ;;  %v8048_v55 = vld [vmem:[%s10275_s3 + $0x670] ss:$152 sps:$4 sm:$0xff]   ;;  %v3786_v56 = vrot.slane %v9927_v47, %v9930_v48 }
 0x2ca   : > { %5942 = vmatprep.subr.bf16.mxu1 %v7975_v57  ;;  %6065 = vmatprep.subr.bf16.mxu0 %v7978_v58  ;;  %v3802_v57 = vrot.slane %v9927_v47, %v9933_v49  ;;  %v8053_v58 = vld [vmem:[%s10275_s3 + $0x78c] ss:$152 sps:$4 sm:$0xff]  }
 0x2cb   : > { %5972 = vmatprep.mubr.bf16.mxu1 %v8143_v60  ;;  %6095 = vmatprep.mubr.bf16.mxu0 %v8143_v60 }
 0x2cd   : > { %5943 = vmatpush1.bf16.msra.mxu1 %v7973_v59  ;;  %6066 = vmatpush1.bf16.msra.mxu0 %v7976_v61  ;;  %v8056_v59 = vld [vmem:[%s10275_s3 + $0x7a4] ss:$152 sps:$4 sm:$0xff]  }
 0x2ce   : > { %5944 = vmatprep.subr.bf16.mxu1 %v7981_v62  ;;  %6067 = vmatprep.subr.bf16.mxu0 %v7984_v63 }
 0x2d1   : > { %5945 = vmatpush1.bf16.msra.mxu1 %v7979_v0  ;;  %6068 = vmatpush1.bf16.msra.mxu0 %v7982_v1 }
 0x2d2   : > { %5946 = vmatprep.subr.bf16.mxu1 %v7987_v2  ;;  %6069 = vmatprep.subr.bf16.mxu0 %v7990_v3 }
 0x2d5   : > { %5947 = vmatpush1.bf16.msra.mxu1 %v7985_v4  ;;  %6070 = vmatpush1.bf16.msra.mxu0 %v7988_v5 }
 0x2d6   : > { %5948 = vmatprep.subr.bf16.mxu1 %v7993_v6  ;;  %6071 = vmatprep.subr.bf16.mxu0 %v7996_v7  ;;  %v8051_v7 = vld [vmem:[%s10275_s3 + $0x788] ss:$152 sps:$4 sm:$0xff]  }
 0x2d9   : > { %5949 = vmatpush1.bf16.msra.mxu1 %v7991_v8  ;;  %6072 = vmatpush1.bf16.msra.mxu0 %v7994_v9  ;;  %v8054_v8 = vld [vmem:[%s10275_s3 + $0x7a0] ss:$152 sps:$4 sm:$0xff]  }
 0x2da   : > { %5950 = vmatprep.subr.bf16.mxu1 %v7999_v10  ;;  %6073 = vmatprep.subr.bf16.mxu0 %v8002_v11  ;;  %v8059_v11 = vld [vmem:[%s10275_s3 + $0x8bc] ss:$152 sps:$4 sm:$0xff]  }
 0x2dd   : > { %5951 = vmatpush1.bf16.msra.mxu1 %v7997_v12  ;;  %6074 = vmatpush1.bf16.msra.mxu0 %v8000_v13  ;;  %v8062_v12 = vld [vmem:[%s10275_s3 + $0x8d4] ss:$152 sps:$4 sm:$0xff]   ;;  %v8057_v13 = vld [vmem:[%s10275_s3 + $0x8b8] ss:$152 sps:$4 sm:$0xff]  }
 0x2de   : > { %5952 = vmatprep.subr.bf16.mxu1 %v8005_v14  ;;  %6075 = vmatprep.subr.bf16.mxu0 %v8008_v15  ;;  %v8060_v14 = vld [vmem:[%s10275_s3 + $0x8d0] ss:$152 sps:$4 sm:$0xff]   ;;  %v8065_v15 = vld [vmem:[%s10275_s3 + $0x7c] ss:$152 sps:$4 sm:$0xff]  }
 0x2e1   : > { %5953 = vmatpush1.bf16.msra.mxu1 %v8003_v16  ;;  %6076 = vmatpush1.bf16.msra.mxu0 %v8006_v17  ;;  %v8068_v16 = vld [vmem:[%s10275_s3 + $0x94] ss:$152 sps:$4 sm:$0xff]   ;;  %v8063_v17 = vld [vmem:[%s10275_s3 + $0x78] ss:$152 sps:$4 sm:$0xff]  }
 0x2e2   : > { %5954 = vmatprep.subr.bf16.mxu1 %v8011_v18  ;;  %6077 = vmatprep.subr.bf16.mxu0 %v8014_v19  ;;  %v8066_v18 = vld [vmem:[%s10275_s3 + $0x90] ss:$152 sps:$4 sm:$0xff]   ;;  %v8071_v19 = vld [vmem:[%s10275_s3 + $0x1ac] ss:$152 sps:$4 sm:$0xff]  }
 0x2e5   : > { %5955 = vmatpush1.bf16.msra.mxu1 %v8009_v21  ;;  %6078 = vmatpush1.bf16.msra.mxu0 %v8012_v22  ;;  %v8074_v21 = vld [vmem:[%s10275_s3 + $0x1c4] ss:$152 sps:$4 sm:$0xff]   ;;  %v8069_v22 = vld [vmem:[%s10275_s3 + $0x1a8] ss:$152 sps:$4 sm:$0xff]  }
 0x2e6   : > { %6022 = vmatprep.subr.bf16.mxu1 %v8017_v23  ;;  %6145 = vmatprep.subr.bf16.mxu0 %v8020_v24  ;;  %v8072_v23 = vld [vmem:[%s10275_s3 + $0x1c0] ss:$152 sps:$4 sm:$0xff]   ;;  %v8077_v24 = vld [vmem:[%s10275_s3 + $0x2dc] ss:$152 sps:$4 sm:$0xff]  }
 0x2e8   : > { %5973 = vmatmul.mubr.bf16.vlgmr.msra.gmra.mrb[60].mxu1 %v9262_v20  ;;  %6096 = vmatmul.mubr.bf16.vlgmr.msra.gmra.mrb[64].mxu0 %v9262_v20 }
 0x2e9   : > { %6023 = vmatpush1.bf16.msra.mxu1 %v8015_v25  ;;  %6146 = vmatpush1.bf16.msra.mxu0 %v8018_v26  ;;  %v8080_v25 = vld [vmem:[%s10275_s3 + $0x2f4] ss:$152 sps:$4 sm:$0xff]   ;;  %v8075_v26 = vld [vmem:[%s10275_s3 + $0x2d8] ss:$152 sps:$4 sm:$0xff]  }
 0x2ea   : > { %6024 = vmatprep.subr.bf16.mxu1 %v8023_v27  ;;  %6147 = vmatprep.subr.bf16.mxu0 %v8026_v28  ;;  %v8078_v27 = vld [vmem:[%s10275_s3 + $0x2f0] ss:$152 sps:$4 sm:$0xff]   ;;  %v8083_v28 = vld [vmem:[%s10275_s3 + $0x40c] ss:$152 sps:$4 sm:$0xff]  }
 0x2eb   : > { %6054 = vmatprep.mubr.bf16.mxu1 %v8143_v60  ;;  %6177 = vmatprep.mubr.bf16.mxu0 %v8143_v60 }
 0x2ed   : > { %6025 = vmatpush1.bf16.msra.mxu1 %v8021_v29  ;;  %6148 = vmatpush1.bf16.msra.mxu0 %v8024_v30  ;;  %v8086_v29 = vld [vmem:[%s10275_s3 + $0x424] ss:$152 sps:$4 sm:$0xff]   ;;  %v8081_v30 = vld [vmem:[%s10275_s3 + $0x408] ss:$152 sps:$4 sm:$0xff]  }
 0x2ee   : > { %6026 = vmatprep.subr.bf16.mxu1 %v8029_v31  ;;  %6149 = vmatprep.subr.bf16.mxu0 %v8032_v32  ;;  %v8084_v31 = vld [vmem:[%s10275_s3 + $0x420] ss:$152 sps:$4 sm:$0xff]   ;;  %v8089_v32 = vld [vmem:[%s10275_s3 + $0x53c] ss:$152 sps:$4 sm:$0xff]  }
 0x2f1   : > { %6027 = vmatpush1.bf16.msra.mxu1 %v8027_v34  ;;  %6150 = vmatpush1.bf16.msra.mxu0 %v8030_v35  ;;  %v10049_v34 = vsub.s32 2, %v9898_v38  ;;  %v8087_v35 = vld [vmem:[%s10275_s3 + $0x538] ss:$152 sps:$4 sm:$0xff]  }
 0x2f2   : > { %6028 = vmatprep.subr.bf16.mxu1 %v8035_v36  ;;  %6151 = vmatprep.subr.bf16.mxu0 %v8038_v37  ;;  %v8090_v36 = vld [vmem:[%s10275_s3 + $0x550] ss:$152 sps:$4 sm:$0xff]  }
 0x2f3   : > { %v10060_v37 = vld [vmem:[%s10276_s4 + $0x8] sm:$0xff] }
 0x2f5   : > { %6029 = vmatpush1.bf16.msra.mxu1 %v8033_v39  ;;  %6152 = vmatpush1.bf16.msra.mxu0 %v8036_v40  ;;  %v10063_v39 = vsub.s32 3, %v9898_v38  ;;  %v8095_v40 = vld [vmem:[%s10275_s3 + $0x66c] ss:$152 sps:$4 sm:$0xff]  }
 0x2f6   : > { %6030 = vmatprep.subr.bf16.mxu1 %v8041_v41  ;;  %6153 = vmatprep.subr.bf16.mxu0 %v8044_v42  ;;  %v8098_v41 = vld [vmem:[%s10275_s3 + $0x684] ss:$152 sps:$4 sm:$0xff]   ;;  %v3790_v42 = vrot.slane %v9927_v47, %v10049_v34 }
 0x2f9   : > { %6031 = vmatpush1.bf16.msra.mxu1 %v8039_v43  ;;  %6154 = vmatpush1.bf16.msra.mxu0 %v8042_v46  ;;  %v3814_v43 = vrot.slane %v10060_v37, %v9916_v44  ;;  %v3794_v46 = vrot.slane %v9927_v47, %v10063_v39 }
 0x2fa   : > { %6032 = vmatprep.subr.bf16.mxu1 %v8047_v50  ;;  %6155 = vmatprep.subr.bf16.mxu0 %v8050_v51  ;;  %v3818_v50 = vrot.slane %v10060_v37, %v9930_v48  ;;  %v8093_v51 = vld [vmem:[%s10275_s3 + $0x668] ss:$152 sps:$4 sm:$0xff]  }
 0x2fb   : > { %v5523_v61 = vpop.f32.mrb[36].mxu1  ;;  %v5605_v62 = vpop.f32.mrb[40].mxu0 }
 0x2fc   : > { %v5524_v63 = vadd.f32 %v5523_v61, %v3782_v52  ;;  %v5606_v0 = vadd.f32 %v5605_v62, %v3798_v53  ;;  %v5525_v1 = vpop.f32.mrb[37].mxu1  ;;  %v5607_v2 = vpop.f32.mrb[41].mxu0  ;;  %v8096_v52 = vld [vmem:[%s10275_s3 + $0x680] ss:$152 sps:$4 sm:$0xff]   ;;  %v8101_v53 = vld [vmem:[%s10275_s3 + $0x79c] ss:$152 sps:$4 sm:$0xff]  }
 0x2fd   : > { %v5526_v3 = vadd.f32 %v5525_v1, %v3786_v56  ;;  %v5608_v4 = vadd.f32 %v5607_v2, %v3802_v57  ;;  %6033 = vmatpush1.bf16.msra.mxu1 %v8045_v54  ;;  %6156 = vmatpush1.bf16.msra.mxu0 %v8048_v55  ;;  %v5527_v5 = vpop.f32.mrb[38].mxu1  ;;  %v5609_v6 = vpop.f32.mrb[42].mxu0  ;;  %v8104_v54 = vld [vmem:[%s10275_s3 + $0x7b4] ss:$152 sps:$4 sm:$0xff]   ;;  %v8099_v2 = vld [vmem:[%s10275_s3 + $0x798] ss:$152 sps:$4 sm:$0xff]  }
 0x2fe   : > { %6268 = vst [vmem:[%s9966_s27] sm:$0xff] %v5524_v63  ;;  %6272 = vst [vmem:[%s9966_s27 + $0x20] sm:$0xff] %v5606_v0  ;;  %v5528_v9 = vpop.f32.mrb[39].mxu1  ;;  %v5610_v10 = vpop.f32.mrb[43].mxu0  ;;  %6034 = vmatprep.subr.bf16.mxu1 %v8053_v58  ;;  %6157 = vmatprep.subr.bf16.mxu0 %v8056_v59  ;;  %v8107_v6 = vld [vmem:[%s10275_s3 + $0x8cc] ss:$152 sps:$4 sm:$0xff]  }
 0x2ff   : > { %6269 = vst [vmem:[%s9966_s27 + $0x8] sm:$0xff] %v5526_v3  ;;  %6273 = vst [vmem:[%s9966_s27 + $0x28] sm:$0xff] %v5608_v4  ;;  %v8102_v3 = vld [vmem:[%s10275_s3 + $0x7b0] ss:$152 sps:$4 sm:$0xff]   ;;  %v8108_v9 = vld [vmem:[%s10275_s3 + $0x8e0] ss:$152 sps:$4 sm:$0xff]  }
 0x300   : > { %v8113_v10 = vld [vmem:[%s10275_s3 + $0x8c] ss:$152 sps:$4 sm:$0xff]  }
 0x301   : > { %6035 = vmatpush1.bf16.msra.mxu1 %v8051_v7  ;;  %6158 = vmatpush1.bf16.msra.mxu0 %v8054_v8  ;;  %v8110_v7 = vld [vmem:[%s10275_s3 + $0x8e4] ss:$152 sps:$4 sm:$0xff]   ;;  %v8105_v8 = vld [vmem:[%s10275_s3 + $0x8c8] ss:$152 sps:$4 sm:$0xff]  }
 0x302   : > { %6036 = vmatprep.subr.bf16.mxu1 %v8059_v11  ;;  %6159 = vmatprep.subr.bf16.mxu0 %v8062_v12  ;;  %v8111_v11 = vld [vmem:[%s10275_s3 + $0x88] ss:$152 sps:$4 sm:$0xff]   ;;  %v8116_v12 = vld [vmem:[%s10275_s3 + $0x1bc] ss:$152 sps:$4 sm:$0xff]  }
 0x305   : > { %6037 = vmatpush1.bf16.msra.mxu1 %v8057_v13  ;;  %6160 = vmatpush1.bf16.msra.mxu0 %v8060_v14  ;;  %v8114_v13 = vld [vmem:[%s10275_s3 + $0x1b8] ss:$152 sps:$4 sm:$0xff]   ;;  %v8119_v14 = vld [vmem:[%s10275_s3 + $0x2ec] ss:$152 sps:$4 sm:$0xff]  }
 0x306   : > { %6104 = vmatprep.subr.bf16.mxu1 %v8065_v15  ;;  %6227 = vmatprep.subr.bf16.mxu0 %v8068_v16  ;;  %v8117_v15 = vld [vmem:[%s10275_s3 + $0x2e8] ss:$152 sps:$4 sm:$0xff]   ;;  %v8122_v16 = vld [vmem:[%s10275_s3 + $0x41c] ss:$152 sps:$4 sm:$0xff]  }
 0x308   : > { %6055 = vmatmul.mubr.bf16.vlgmr.msra.gmra.mrb[64].mxu1 %v9262_v20  ;;  %6178 = vmatmul.mubr.bf16.vlgmr.msra.gmra.mrb[68].mxu0 %v9262_v20 }
 0x309   : > { %6105 = vmatpush1.bf16.msra.mxu1 %v8063_v17  ;;  %6228 = vmatpush1.bf16.msra.mxu0 %v8066_v18  ;;  %v8125_v17 = vld [vmem:[%s10275_s3 + $0x54c] ss:$152 sps:$4 sm:$0xff]   ;;  %v10144_v18 = vsub.s32 6, %v9898_v38 }
 0x30a   : > { %6106 = vmatprep.subr.bf16.mxu1 %v8071_v19  ;;  %6229 = vmatprep.subr.bf16.mxu0 %v8074_v21  ;;  %v8123_v19 = vld [vmem:[%s10275_s3 + $0x548] ss:$152 sps:$4 sm:$0xff]   ;;  %v10150_v21 = vsub.s32 7, %v9898_v38  ;;  %v8126_v38 = vld [vmem:[%s10275_s3 + $0x678] ss:$152 sps:$4 sm:$0xff]  }
 0x30b   : > { %6136 = vmatprep.mubr.bf16.mxu1 %v8143_v60  ;;  %6259 = vmatprep.mubr.bf16.mxu0 %v8143_v60 }
 0x30d   : > { %6107 = vmatpush1.bf16.msra.mxu1 %v8069_v22  ;;  %6230 = vmatpush1.bf16.msra.mxu0 %v8072_v23  ;;  %v8128_v22 = vld [vmem:[%s10275_s3 + $0x67c] ss:$152 sps:$4 sm:$0xff]   ;;  %v3806_v23 = vrot.slane %v9927_v47, %v10144_v18 }
 0x30e   : > { %6108 = vmatprep.subr.bf16.mxu1 %v8077_v24  ;;  %6231 = vmatprep.subr.bf16.mxu0 %v8080_v25  ;;  %v3830_v24 = vrot.slane %v10060_v37, %v9919_v45  ;;  %v3810_v25 = vrot.slane %v9927_v47, %v10150_v21 }
 0x311   : > { %6109 = vmatpush1.bf16.msra.mxu1 %v8075_v26  ;;  %6232 = vmatpush1.bf16.msra.mxu0 %v8078_v27  ;;  %v3834_v26 = vrot.slane %v10060_v37, %v9933_v49  ;;  %v8131_v27 = vld [vmem:[%s10275_s3 + $0x7ac] ss:$152 sps:$4 sm:$0xff]  }
 0x312   : > { %6110 = vmatprep.subr.bf16.mxu1 %v8083_v28  ;;  %6233 = vmatprep.subr.bf16.mxu0 %v8086_v29 }
 0x315   : > { %6111 = vmatpush1.bf16.msra.mxu1 %v8081_v30  ;;  %6234 = vmatpush1.bf16.msra.mxu0 %v8084_v31 }
 0x316   : > { %6112 = vmatprep.subr.bf16.mxu1 %v8089_v32  ;;  %6235 = vmatprep.subr.bf16.mxu0 %v8092_v33 }
 0x319   : > { %6113 = vmatpush1.bf16.msra.mxu1 %v8087_v35  ;;  %6236 = vmatpush1.bf16.msra.mxu0 %v8090_v36 }
 0x31a   : > { %6114 = vmatprep.subr.bf16.mxu1 %v8095_v40  ;;  %6237 = vmatprep.subr.bf16.mxu0 %v8098_v41  ;;  %v8129_v41 = vld [vmem:[%s10275_s3 + $0x7a8] ss:$152 sps:$4 sm:$0xff]  }
 0x31b   : > { %v5564_v55 = vpop.f32.mrb[40].mxu1  ;;  %v5687_v56 = vpop.f32.mrb[44].mxu0 }
 0x31c   : > { %v5565_v57 = vadd.f32 %v5564_v55, %v3790_v42  ;;  %v5688_v58 = vadd.f32 %v5687_v56, %v3814_v43  ;;  %v5566_v59 = vpop.f32.mrb[41].mxu1  ;;  %v5689_v61 = vpop.f32.mrb[45].mxu0 }
 0x31d   : > { %v5567_v62 = vadd.f32 %v5566_v59, %v3794_v46  ;;  %v5690_v63 = vadd.f32 %v5689_v61, %v3818_v50  ;;  %v5568_v0 = vpop.f32.mrb[42].mxu1  ;;  %v5691_v1 = vpop.f32.mrb[46].mxu0  ;;  %6115 = vmatpush1.bf16.msra.mxu1 %v8093_v51  ;;  %6238 = vmatpush1.bf16.msra.mxu0 %v8096_v52  ;;  %v8134_v46 = vld [vmem:[%s10275_s3 + $0x8dc] ss:$152 sps:$4 sm:$0xff]   ;;  %v8132_v50 = vld [vmem:[%s10275_s3 + $0x8d8] ss:$152 sps:$4 sm:$0xff]   ;;  %v3822_v52 = vrot.slane %v10060_v37, %v10049_v34 }
 0x31e   : > { %6270 = vst [vmem:[%s9966_s27 + $0x10] sm:$0xff] %v5565_v57  ;;  %6276 = vst [vmem:[%s9966_s27 + $0x40] sm:$0xff] %v5688_v58  ;;  %v5569_v4 = vpop.f32.mrb[43].mxu1  ;;  %v5692_v5 = vpop.f32.mrb[47].mxu0  ;;  %6116 = vmatprep.subr.bf16.mxu1 %v8101_v53  ;;  %6239 = vmatprep.subr.bf16.mxu0 %v8104_v54  ;;  %v10186_v51 = vld [vmem:[%s10276_s4 + $0x10] sm:$0xff]  ;;  %v3826_v54 = vrot.slane %v10060_v37, %v10063_v39 }
 0x31f   : > { %6271 = vst [vmem:[%s9966_s27 + $0x18] sm:$0xff] %v5567_v62  ;;  %6277 = vst [vmem:[%s9966_s27 + $0x48] sm:$0xff] %v5690_v63  ;;  %v3846_v53 = vrot.slane %v10186_v51, %v9916_v44  ;;  %v3838_v4 = vrot.slane %v10060_v37, %v10144_v18  ;;  %v3862_v5 = vrot.slane %v10186_v51, %v9919_v45 }
 0x321   : > { %6117 = vmatpush1.bf16.msra.mxu1 %v8099_v2  ;;  %6240 = vmatpush1.bf16.msra.mxu0 %v8102_v3 }
 0x322   : > { %6118 = vmatprep.subr.bf16.mxu1 %v8107_v6  ;;  %6241 = vmatprep.subr.bf16.mxu0 %v8110_v7  ;;  %v3842_v6 = vrot.slane %v10060_v37, %v10150_v21  ;;  %v3866_v7 = vrot.slane %v10186_v51, %v9933_v49  ;;  %v10215_v37 = vld [vmem:[%s10276_s4 + $0x18] sm:$0xff] }
 0x325   : > { %6119 = vmatpush1.bf16.msra.mxu1 %v8105_v8  ;;  %6242 = vmatpush1.bf16.msra.mxu0 %v8108_v9 }
 0x326   : > { %6186 = vmatprep.subr.bf16.mxu1 %v8113_v10 }
 0x328   : > { %6137 = vmatmul.mubr.bf16.vlgmr.msra.gmra.mrb[68].mxu1 %v9262_v20  ;;  %6260 = vmatmul.mubr.bf16.vlgmr.msra.gmra.mrb[72].mxu0 %v9262_v20 }
 0x329   : > { %6187 = vmatpush1.bf16.msra.mxu1 %v8111_v11  ;;  %6218 = vmatprep.mubr.bf16.mxu1 %v8143_v60  ;;  %v8120_v60 = vld [vmem:[%s10275_s3 + $0x418] ss:$152 sps:$4 sm:$0xff]  }
 0x32a   : > { %6188 = vmatprep.subr.bf16.mxu1 %v8116_v12 }
 0x32d   : > { %6189 = vmatpush1.bf16.msra.mxu1 %v8114_v13 }
 0x32e   : > { %6190 = vmatprep.subr.bf16.mxu1 %v8119_v14 }
 0x331   : > { %6191 = vmatpush1.bf16.msra.mxu1 %v8117_v15 }
 0x332   : > { %6192 = vmatprep.subr.bf16.mxu1 %v8122_v16 }
 0x335   : > { %6193 = vmatpush1.bf16.msra.mxu1 %v8120_v60 }
 0x336   : > { %6194 = vmatprep.subr.bf16.mxu1 %v8125_v17 }
 0x339   : > { %6195 = vmatpush1.bf16.msra.mxu1 %v8123_v19 }
 0x33a   : > { %6196 = vmatprep.subr.bf16.mxu1 %v8128_v22  ;;  %v3854_v22 = vrot.slane %v10186_v51, %v10049_v34 }
 0x33b   : > { %v5646_v28 = vpop.f32.mrb[44].mxu1  ;;  %v5769_v29 = vpop.f32.mrb[48].mxu0 }
 0x33c   : > { %v5647_v30 = vadd.f32 %v5646_v28, %v3806_v23  ;;  %v5770_v31 = vadd.f32 %v5769_v29, %v3830_v24  ;;  %v5648_v47 = vpop.f32.mrb[45].mxu1  ;;  %v5771_v32 = vpop.f32.mrb[49].mxu0  ;;  %v3878_v23 = vrot.slane %v10215_v37, %v9916_v44  ;;  %v3858_v24 = vrot.slane %v10186_v51, %v10063_v39 }
 0x33d   : > { %v5649_v33 = vadd.f32 %v5648_v47, %v3810_v25  ;;  %v5772_v35 = vadd.f32 %v5771_v32, %v3834_v26  ;;  %v5650_v36 = vpop.f32.mrb[46].mxu1  ;;  %v5773_v40 = vpop.f32.mrb[50].mxu0  ;;  %6197 = vmatpush1.bf16.msra.mxu1 %v8126_v38  ;;  %v3882_v25 = vrot.slane %v10215_v37, %v9930_v48 }
 0x33e   : > { %6274 = vst [vmem:[%s9966_s27 + $0x30] sm:$0xff] %v5647_v30  ;;  %6280 = vst [vmem:[%s9966_s27 + $0x60] sm:$0xff] %v5770_v31  ;;  %v5651_v42 = vpop.f32.mrb[47].mxu1  ;;  %v5774_v43 = vpop.f32.mrb[51].mxu0  ;;  %6198 = vmatprep.subr.bf16.mxu1 %v8131_v27  ;;  %v3870_v40 = vrot.slane %v10186_v51, %v10144_v18 }
 0x33f   : > { %6275 = vst [vmem:[%s9966_s27 + $0x38] sm:$0xff] %v5649_v33  ;;  %6281 = vst [vmem:[%s9966_s27 + $0x68] sm:$0xff] %v5772_v35  ;;  %v3874_v42 = vrot.slane %v10186_v51, %v10150_v21  ;;  %v3898_v43 = vrot.slane %v10215_v37, %v9933_v49 }
 0x341   : > { %6199 = vmatpush1.bf16.msra.mxu1 %v8129_v41  ;;  %v3894_v41 = vrot.slane %v10215_v37, %v9919_v45 }
 0x342   : > { %6200 = vmatprep.subr.bf16.mxu1 %v8134_v46 }
 0x345   : > { %6201 = vmatpush1.bf16.msra.mxu1 %v8132_v50 }
 0x348   : > { %6219 = vmatmul.mubr.bf16.vlgmr.msra.gmra.mrb[72].mxu1 %v9262_v20  ;;  %v3850_v20 = vrot.slane %v10186_v51, %v9930_v48  ;;  %v3773_v51 = vld [vmem:[%s10276_s4 + $0x20] sm:$0x3f] }
 0x35b   : > { %v5728_v55 = vpop.f32.mrb[48].mxu1  ;;  %v5851_v56 = vpop.f32.mrb[52].mxu0 }
 0x35c   : > { %v5729_v57 = vadd.f32 %v5728_v55, %v3822_v52  ;;  %v5852_v58 = vadd.f32 %v5851_v56, %v3846_v53  ;;  %v5730_v59 = vpop.f32.mrb[49].mxu1  ;;  %v5853_v61 = vpop.f32.mrb[53].mxu0 }
 0x35d   : > { %v5731_v62 = vadd.f32 %v5730_v59, %v3826_v54  ;;  %v5854_v63 = vadd.f32 %v5853_v61, %v3850_v20  ;;  %v5732_v0 = vpop.f32.mrb[50].mxu1  ;;  %v5855_v1 = vpop.f32.mrb[54].mxu0 }
 0x35e   : > { %6278 = vst [vmem:[%s9966_s27 + $0x50] sm:$0xff] %v5729_v57  ;;  %6284 = vst [vmem:[%s9966_s27 + $0x80] sm:$0xff] %v5852_v58  ;;  %v5733_v2 = vpop.f32.mrb[51].mxu1  ;;  %v5856_v3 = vpop.f32.mrb[55].mxu0  ;;  %v3890_v0 = vrot.slane %v10215_v37, %v10063_v39  ;;  %v3914_v1 = vrot.slane %v3773_v51, %v9930_v48  ;;  %v3902_v48 = vrot.slane %v10215_v37, %v10144_v18 }
 0x35f   : > { %6279 = vst [vmem:[%s9966_s27 + $0x58] sm:$0xff] %v5731_v62  ;;  %6285 = vst [vmem:[%s9966_s27 + $0x88] sm:$0xff] %v5854_v63  ;;  %v3886_v62 = vrot.slane %v10215_v37, %v10049_v34  ;;  %v3910_v63 = vrot.slane %v3773_v51, %v9916_v44 }
 0x37b   : > { %v5810_v8 = vpop.f32.mrb[52].mxu1  ;;  %v5933_v9 = vpop.f32.mrb[56].mxu0 }
 0x37c   : > { %v5811_v10 = vadd.f32 %v5810_v8, %v3838_v4  ;;  %v5934_v11 = vadd.f32 %v5933_v9, %v3862_v5  ;;  %v5812_v12 = vpop.f32.mrb[53].mxu1  ;;  %v5935_v13 = vpop.f32.mrb[57].mxu0 }
 0x37d   : > { %v5813_v14 = vadd.f32 %v5812_v12, %v3842_v6  ;;  %v5936_v15 = vadd.f32 %v5935_v13, %v3866_v7  ;;  %v5814_v16 = vpop.f32.mrb[54].mxu1  ;;  %v5937_v60 = vpop.f32.mrb[58].mxu0  ;;  %v3926_v13 = vrot.slane %v3773_v51, %v9919_v45 }
 0x37e   : > { %6282 = vst [vmem:[%s9966_s27 + $0x70] sm:$0xff] %v5811_v10  ;;  %6288 = vst [vmem:[%s9966_s27 + $0xa0] sm:$0xff] %v5934_v11  ;;  %v5815_v17 = vpop.f32.mrb[55].mxu1  ;;  %v5938_v19 = vpop.f32.mrb[59].mxu0 }
 0x37f   : > { %6283 = vst [vmem:[%s9966_s27 + $0x78] sm:$0xff] %v5813_v14  ;;  %6289 = vst [vmem:[%s9966_s27 + $0xa8] sm:$0xff] %v5936_v15  ;;  %v3906_v14 = vrot.slane %v10215_v37, %v10150_v21  ;;  %v3930_v15 = vrot.slane %v3773_v51, %v9933_v49  ;;  %v3918_v49 = vrot.slane %v3773_v51, %v10049_v34 }
 0x380   : > { %v3922_v37 = vrot.slane %v3773_v51, %v10063_v39 }
 0x39b   : > { %v5892_v26 = vpop.f32.mrb[56].mxu1  ;;  %v6015_v38 = vpop.f32.mrb[60].mxu0 }
 0x39c   : > { %v5893_v27 = vadd.f32 %v5892_v26, %v3854_v22  ;;  %v6016_v28 = vadd.f32 %v6015_v38, %v3878_v23  ;;  %v5894_v29 = vpop.f32.mrb[57].mxu1  ;;  %v6017_v30 = vpop.f32.mrb[61].mxu0 }
 0x39d   : > { %v5895_v31 = vadd.f32 %v5894_v29, %v3858_v24  ;;  %v6018_v47 = vadd.f32 %v6017_v30, %v3882_v25  ;;  %v5896_v32 = vpop.f32.mrb[58].mxu1  ;;  %v6019_v33 = vpop.f32.mrb[62].mxu0 }
 0x39e   : > { %6286 = vst [vmem:[%s9966_s27 + $0x90] sm:$0xff] %v5893_v27  ;;  %6292 = vst [vmem:[%s9966_s27 + $0xc0] sm:$0xff] %v6016_v28  ;;  %v5897_v35 = vpop.f32.mrb[59].mxu1  ;;  %v6020_v36 = vpop.f32.mrb[63].mxu0 }
 0x39f   : > { %6287 = vst [vmem:[%s9966_s27 + $0x98] sm:$0xff] %v5895_v31  ;;  %6293 = vst [vmem:[%s9966_s27 + $0xc8] sm:$0xff] %v6018_v47 }
 0x3bb   : > { %v5974_v46 = vpop.f32.mrb[60].mxu1  ;;  %v6097_v50 = vpop.f32.mrb[64].mxu0 }
 0x3bc   : > { %v5975_v52 = vadd.f32 %v5974_v46, %v3870_v40  ;;  %v6098_v53 = vadd.f32 %v6097_v50, %v3894_v41  ;;  %v5976_v54 = vpop.f32.mrb[61].mxu1  ;;  %v6099_v20 = vpop.f32.mrb[65].mxu0 }
 0x3bd   : > { %v5977_v55 = vadd.f32 %v5976_v54, %v3874_v42  ;;  %v6100_v56 = vadd.f32 %v6099_v20, %v3898_v43  ;;  %v5978_v57 = vpop.f32.mrb[62].mxu1  ;;  %v6101_v58 = vpop.f32.mrb[66].mxu0 }
 0x3be   : > { %6290 = vst [vmem:[%s9966_s27 + $0xb0] sm:$0xff] %v5975_v52  ;;  %6296 = vst [vmem:[%s9966_s27 + $0xe0] sm:$0xff] %v6098_v53  ;;  %v5979_v59 = vpop.f32.mrb[63].mxu1  ;;  %v6102_v61 = vpop.f32.mrb[67].mxu0 }
 0x3bf   : > { %6291 = vst [vmem:[%s9966_s27 + $0xb8] sm:$0xff] %v5977_v55  ;;  %6297 = vst [vmem:[%s9966_s27 + $0xe8] sm:$0xff] %v6100_v56 }
 0x3db   : > { %v6056_v2 = vpop.f32.mrb[64].mxu1  ;;  %v6179_v3 = vpop.f32.mrb[68].mxu0 }
 0x3dc   : > { %v6057_v4 = vadd.f32 %v6056_v2, %v3886_v62  ;;  %v6180_v5 = vadd.f32 %v6179_v3, %v3910_v63  ;;  %v6058_v6 = vpop.f32.mrb[65].mxu1  ;;  %v6181_v7 = vpop.f32.mrb[69].mxu0 }
 0x3dd   : > { %v6059_v8 = vadd.f32 %v6058_v6, %v3890_v0  ;;  %v6182_v9 = vadd.f32 %v6181_v7, %v3914_v1  ;;  %v6060_v10 = vpop.f32.mrb[66].mxu1  ;;  %v6183_v11 = vpop.f32.mrb[70].mxu0 }
 0x3de   : > { %6294 = vst [vmem:[%s9966_s27 + $0xd0] sm:$0xff] %v6057_v4  ;;  %6300 = vst [vmem:[%s9966_s27 + $0x100] sm:$0xff] %v6180_v5  ;;  %v6061_v44 = vpop.f32.mrb[67].mxu1  ;;  %v6184_v12 = vpop.f32.mrb[71].mxu0 }
 0x3df   : > { %6295 = vst [vmem:[%s9966_s27 + $0xd8] sm:$0xff] %v6059_v8  ;;  %6301 = vst [vmem:[%s9966_s27 + $0x108] sm:$0xff] %v6182_v9 }
 0x3fb   : > { %v6138_v16 = vpop.f32.mrb[68].mxu1  ;;  %v6261_v60 = vpop.f32.mrb[72].mxu0 }
 0x3fc   : > { %v6139_v17 = vadd.f32 %v6138_v16, %v3902_v48  ;;  %v6262_v19 = vadd.f32 %v6261_v60, %v3926_v13  ;;  %v6140_v22 = vpop.f32.mrb[69].mxu1  ;;  %v6263_v23 = vpop.f32.mrb[73].mxu0 }
 0x3fd   : > { %v6141_v24 = vadd.f32 %v6140_v22, %v3906_v14  ;;  %v6264_v25 = vadd.f32 %v6263_v23, %v3930_v15  ;;  %v6142_v26 = vpop.f32.mrb[70].mxu1  ;;  %v6265_v18 = vpop.f32.mrb[74].mxu0 }
 0x3fe   : > { %6298 = vst [vmem:[%s9966_s27 + $0xf0] sm:$0xff] %v6139_v17  ;;  %6304 = vst [vmem:[%s9966_s27 + $0x120] sm:$0xff] %v6262_v19  ;;  %v6143_v45 = vpop.f32.mrb[71].mxu1  ;;  %v6266_v21 = vpop.f32.mrb[75].mxu0 }
 0x3ff   : > { %6299 = vst [vmem:[%s9966_s27 + $0xf8] sm:$0xff] %v6141_v24  ;;  %6305 = vst.msk [vmem:[%s9966_s27 + $0x128] sm:$0xff] %vm2692_vm0, %v6264_v25 }
 0x41b   : > { %v6220_v38 = vpop.f32.mrb[72].mxu1 }
 0x41c   : > { %v6221_v27 = vadd.f32 %v6220_v38, %v3918_v49  ;;  %v6222_v28 = vpop.f32.mrb[73].mxu1 }
 0x41d   : > { %v6223_v29 = vadd.f32 %v6222_v28, %v3922_v37  ;;  %v6224_v30 = vpop.f32.mrb[74].mxu1 }
 0x41e   : > { %6302 = vst [vmem:[%s9966_s27 + $0x110] sm:$0xff] %v6221_v27  ;;  %v6225_v31 = vpop.f32.mrb[75].mxu1 }
 0x41f   : > { %6303 = vst [vmem:[%s9966_s27 + $0x118] sm:$0xff] %v6223_v29 }
 0x420 PF: > { %s15_s18 = sadd.s32 1, %s8141_s18  }
 0x421   : > { %p12_p4 = scmp.ge.s32.totalorder %s15_s18, 4  }
 0x423   :  { %14 = sbr.rel (!%p12_p4) target bundleno = 1 (0x1), region = 70 }

</bundles_post_ra>
